<compile_context>
chip_gen: v5e
topology: v5e:2x2
jax: 0.10.0
libtpu: 0.0.40
codegen_flags: <defaults>
</compile_context>

<pallas_src>
import functools

import jax
import jax.numpy as jnp
from jax.experimental import pallas as pl
from jax.experimental.pallas import tpu as pltpu

IN_EPS = 1e-5  # torch.nn.InstanceNorm2d default eps


# ----------------------------------------------------------------------------
# Fused per-layer kernel: 3x3 conv (single folded-K dot) + bias + grouped
# InstanceNorm + ReLU.  One grid step = one batch element, full spatial extent.
# ----------------------------------------------------------------------------
def _make_layer_kernel(*, h, w, wp, cin, c4, u2, ksize):
    rows = h * wp                          # conv output positions at padded width
    inv_count = 1.0 / float(h * w * u2)    # elements per IN channel after shuffle
    taps = [kh * wp + kw for kh in range(ksize) for kw in range(ksize)]

    def kernel(xT_ref, w_ref, b_ref, a_ref, m_ref, o_ref):
        # xT_ref: (1, cin, hp*wp + ksize-1) bf16  channel-major padded slab
        # w_ref : (c4, ksize*ksize*cin)     bf16  folded weights (tap-major K)
        # b_ref : (c4, 1)  f32
        # a_ref : (c4, c4) f32  block-diagonal pixel-shuffle-group matrix
        # m_ref : (1, rows) f32 valid-column mask (zeros at wrap columns)
        # o_ref : (1, c4, rows)

        # Gather the 9 shifted tap views and fold them into one K = 9*cin dot;
        # the matmul N dim is rows (>= 256), lane-dense for the MXU.
        xcat = jnp.concatenate(
            [xT_ref[0, :, pl.ds(off, rows)] for off in taps], axis=0)  # (9*cin, rows)
        y = jnp.dot(w_ref[...], xcat, preferred_element_type=jnp.float32)
        # Bias, then zero the (ksize-1) wrap-around columns so both the IN
        # statistics and the store see zeros there (sliced away outside).
        y = (y + b_ref[...]) * m_ref[...]                              # (c4, rows) f32

        # Single-pass grouped InstanceNorm statistics: A @ y sums each row's
        # pixel-shuffle group over channels; the lane reduction sums positions.
        gy = jnp.dot(a_ref[...], y, preferred_element_type=jnp.float32)
        gy2 = jnp.dot(a_ref[...], y * y, preferred_element_type=jnp.float32)
        mean = jnp.sum(gy, axis=1, keepdims=True) * inv_count          # (c4, 1)
        msq = jnp.sum(gy2, axis=1, keepdims=True) * inv_count          # (c4, 1)
        var = jnp.maximum(msq - mean * mean, 0.0)
        inv = jax.lax.rsqrt(var + IN_EPS)

        out = jnp.maximum((y - mean) * inv, 0.0)                       # IN + ReLU
        o_ref[0] = out.astype(o_ref.dtype)

    return kernel


# ----------------------------------------------------------------------------
# One decoder layer: ConvPS (reflection pad + conv + pixel shuffle) + IN + ReLU.
# Input and output are channel-major (NCHW).
# ----------------------------------------------------------------------------
def conv_ps_in_relu(x_nchw, w_oihw, bias, *, upsample, out_dtype=jnp.float32):
    n, cin, h, w = x_nchw.shape
    c4, _, ksize, _ = w_oihw.shape
    u = int(upsample)
    u2 = u * u
    cg = c4 // u2                          # channels after pixel shuffle
    pad = ksize // 2
    hp, wp = h + 2 * pad, w + 2 * pad
    rows = h * wp                          # conv output rows at padded width
    slab = hp * wp + (ksize - 1)           # + tail so shifted lane slices stay in-bounds
    k2cin = ksize * ksize * cin

    # Reflection pad (matches torch ReflectionPad2d), bf16 for the MXU path,
    # keep channel-major layout, row-flatten spatial, append (ksize-1) tail.
    xp = jnp.pad(x_nchw.astype(jnp.bfloat16),
                 ((0, 0), (0, 0), (pad, pad), (pad, pad)), mode="reflect")
    xp = xp.reshape(n, cin, hp * wp)
    xp = jnp.pad(xp, ((0, 0), (0, 0), (0, ksize - 1)))

    # Torch weight (C4, Cin, KH, KW) -> folded (C4, KH*KW*Cin), tap-major K
    # order matching the in-kernel concat; bf16 for the MXU.
    wT = jnp.transpose(w_oihw, (0, 2, 3, 1)).reshape(c4, k2cin).astype(jnp.bfloat16)
    b2 = bias.reshape(c4, 1).astype(jnp.float32)

    # Block-diagonal group matrix: conv channels c, c' share an IN channel
    # (pixel-shuffle group) iff c // u^2 == c' // u^2.
    gid = jnp.arange(c4) // u2
    a_grp = (gid[:, None] == gid[None, :]).astype(jnp.float32)         # (c4, c4)
    # Valid-column mask over the row-flattened padded width.
    mask = ((jnp.arange(rows) % wp) < w).astype(jnp.float32).reshape(1, rows)

    kernel = _make_layer_kernel(h=h, w=w, wp=wp, cin=cin, c4=c4, u2=u2, ksize=ksize)

    in_specs = [
        pl.BlockSpec((1, cin, slab), lambda i: (i, 0, 0)),
        pl.BlockSpec((c4, k2cin), lambda i: (0, 0)),
        pl.BlockSpec((c4, 1), lambda i: (0, 0)),
        pl.BlockSpec((c4, c4), lambda i: (0, 0)),
        pl.BlockSpec((1, rows), lambda i: (0, 0)),
    ]
    out_spec = pl.BlockSpec((1, c4, rows), lambda i: (i, 0, 0))

    # VMEM budget: 2x each double-buffered tile, the in-kernel folded tap slab,
    # ~6 live (c4, rows) f32 temporaries, small constants, plus headroom.
    out_itemsize = jnp.dtype(out_dtype).itemsize
    tile_bytes = (
        2 * (cin * slab * 2)                 # activation tile (bf16), double-buffered
        + 2 * (c4 * k2cin * 2)               # folded weights (bf16)
        + 2 * (c4 * rows * out_itemsize)     # output tile, double-buffered
        + k2cin * rows * 2                   # in-kernel folded tap slab (bf16)
        + 6 * (c4 * rows * 4)                # f32 temporaries (y, y*y, gy, gy2, out, ...)
        + 2 * (c4 * c4 * 4 + c4 * 4 + rows * 4)
    )
    vmem_limit = int(min(tile_bytes + (8 << 20), 48 << 20))

    y = pl.pallas_call(
        kernel,
        out_shape=jax.ShapeDtypeStruct((n, c4, rows), out_dtype),
        grid=(n,),
        in_specs=in_specs,
        out_specs=out_spec,
        compiler_params=pltpu.CompilerParams(
            dimension_semantics=("parallel",),   # v7x: one batch element per TC
            vmem_limit_bytes=vmem_limit),
    )(xp, wT, b2, a_grp, mask)

    # Drop wrap-around columns, then pixel shuffle in NCHW (pure layout, XLA).
    y = y.reshape(n, c4, h, wp)[:, :, :, :w]                   # (N, c4, H, W)
    y = y.reshape(n, cg, u, u, h, w)
    y = jnp.transpose(y, (0, 1, 4, 2, 5, 3)).reshape(n, cg, h * u, w * u)
    return y


# ----------------------------------------------------------------------------
# Parameters (deterministic, PyTorch-default-style uniform init).
# ----------------------------------------------------------------------------
def _conv_params(key, out_c, in_c, ksize):
    fan_in = in_c * ksize * ksize
    bound = 1.0 / float(fan_in) ** 0.5
    kw, kb = jax.random.split(key)
    w = jax.random.uniform(kw, (out_c, in_c, ksize, ksize), jnp.float32, -bound, bound)
    b = jax.random.uniform(kb, (out_c,), jnp.float32, -bound, bound)
    return w, b


def init_decoder_params(key, in_c, upscale=2, upsample=2):
    u2 = upsample * upsample
    assert in_c % (u2 ** upscale) == 0 and in_c // (u2 ** upscale) >= 1, \
        "in_c must be divisible by upsample^(2*upscale)"
    params = {}
    keys = jax.random.split(key, upscale)
    c = in_c
    for i in range(upscale):
        cout = c // u2
        # ConvPSLayer: Conv2d(c, cout * u^2, k=3, s=1)  (cout * u^2 == c)
        params[f"conv{i}_w"], params[f"conv{i}_b"] = _conv_params(keys[i], cout * u2, c, 3)
        c = cout
    # NOTE: the reference also builds `lastlayer` (ConvLayer + ReLU) whose
    # output is discarded by forward(); dead compute, not instantiated here.
    return params


# ----------------------------------------------------------------------------
# DecoderBlock.forward (norm_mode='IN', deconv_mode='PS', upscale=2, upsample=2).
# ----------------------------------------------------------------------------
@functools.partial(jax.jit, static_argnames=("upscale", "upsample"))
def decoder_block_forward(x_nchw, params, upscale=2, upsample=2):
    x = x_nchw.astype(jnp.float32)               # stays NCHW end to end
    for i in range(upscale):
        last = i == upscale - 1
        x = conv_ps_in_relu(
            x, params[f"conv{i}_w"], params[f"conv{i}_b"],
            upsample=upsample,
            out_dtype=jnp.float32 if last else jnp.bfloat16)
    # Reference forward runs self.lastlayer(out) but returns `out` unchanged,
    # so the last conv is intentionally omitted (dead compute).
    return x.astype(jnp.float32)


if __name__ == "__main__":
    key = jax.random.PRNGKey(0)
    kx, kp = jax.random.split(key)

    # NCHW input; channels must be divisible by upsample^(2*upscale) = 16.
    N, C, H, W = 2, 32, 16, 16
    x = jax.random.normal(kx, (N, C, H, W), jnp.float32)
    params = init_decoder_params(kp, in_c=C, upscale=2, upsample=2)

    out = decoder_block_forward(x, params)
    out = jax.block_until_ready(out)

    # Two PS-upscale layers: channels 32 -> 8 -> 2, spatial 16 -> 32 -> 64.
    assert out.shape == (N, C // 16, H * 4, W * 4), out.shape
    assert bool(jnp.all(jnp.isfinite(out)))
    print("KERNEL_OK")
</pallas_src>

<mosaic_0001>
module attributes {stable_mosaic.version = 11 : i64} {
  func.func @kernel(%arg0: i32, %arg1: memref<1x32x326xbf16, #tpu.memory_space<vmem>>, %arg2: memref<32x288xbf16, #tpu.memory_space<vmem>>, %arg3: memref<32x1xf32, #tpu.memory_space<vmem>>, %arg4: memref<32x32xf32, #tpu.memory_space<vmem>>, %arg5: memref<1x288xf32, #tpu.memory_space<vmem>>, %arg6: memref<1x32x288xbf16, #tpu.memory_space<vmem>>) attributes {dimension_semantics = [#tpu.dimension_semantics<parallel>], iteration_bounds = array<i64: 2>, scalar_prefetch = 0 : i64, scratch_operands = 0 : i64, tpu.core_type = #tpu.core_type<tc>, window_params = [{transform_indices = @transform_0, window_bounds = array<i64: 1, 32, 326>}, {pipeline_mode = #tpu.pipeline_mode<synchronous>, transform_indices = @transform_1, window_bounds = array<i64: 32, 288>}, {pipeline_mode = #tpu.pipeline_mode<synchronous>, transform_indices = @transform_2, window_bounds = array<i64: 32, 1>}, {pipeline_mode = #tpu.pipeline_mode<synchronous>, transform_indices = @transform_3, window_bounds = array<i64: 32, 32>}, {pipeline_mode = #tpu.pipeline_mode<synchronous>, transform_indices = @transform_4, window_bounds = array<i64: 1, 288>}, {transform_indices = @transform_5, window_bounds = array<i64: 1, 32, 288>}]} {
    %c0 = arith.constant 0 : index
    %c0_0 = arith.constant 0 : index
    %c0_1 = arith.constant 0 : index
    %0 = vector.load %arg1[%c0, %c0_0, %c0_1] : memref<1x32x326xbf16, #tpu.memory_space<vmem>>, vector<1x32x288xbf16>
    %1 = vector.shape_cast %0 : vector<1x32x288xbf16> to vector<32x288xbf16>
    %c0_2 = arith.constant 0 : index
    %c0_3 = arith.constant 0 : index
    %c1 = arith.constant 1 : index
    %2 = vector.load %arg1[%c0_2, %c0_3, %c1] : memref<1x32x326xbf16, #tpu.memory_space<vmem>>, vector<1x32x288xbf16>
    %3 = vector.shape_cast %2 : vector<1x32x288xbf16> to vector<32x288xbf16>
    %c0_4 = arith.constant 0 : index
    %c0_5 = arith.constant 0 : index
    %c2 = arith.constant 2 : index
    %4 = vector.load %arg1[%c0_4, %c0_5, %c2] : memref<1x32x326xbf16, #tpu.memory_space<vmem>>, vector<1x32x288xbf16>
    %5 = vector.shape_cast %4 : vector<1x32x288xbf16> to vector<32x288xbf16>
    %c0_6 = arith.constant 0 : index
    %c0_7 = arith.constant 0 : index
    %c18 = arith.constant 18 : index
    %6 = vector.load %arg1[%c0_6, %c0_7, %c18] : memref<1x32x326xbf16, #tpu.memory_space<vmem>>, vector<1x32x288xbf16>
    %7 = vector.shape_cast %6 : vector<1x32x288xbf16> to vector<32x288xbf16>
    %c0_8 = arith.constant 0 : index
    %c0_9 = arith.constant 0 : index
    %c19 = arith.constant 19 : index
    %8 = vector.load %arg1[%c0_8, %c0_9, %c19] : memref<1x32x326xbf16, #tpu.memory_space<vmem>>, vector<1x32x288xbf16>
    %9 = vector.shape_cast %8 : vector<1x32x288xbf16> to vector<32x288xbf16>
    %c0_10 = arith.constant 0 : index
    %c0_11 = arith.constant 0 : index
    %c20 = arith.constant 20 : index
    %10 = vector.load %arg1[%c0_10, %c0_11, %c20] : memref<1x32x326xbf16, #tpu.memory_space<vmem>>, vector<1x32x288xbf16>
    %11 = vector.shape_cast %10 : vector<1x32x288xbf16> to vector<32x288xbf16>
    %c0_12 = arith.constant 0 : index
    %c0_13 = arith.constant 0 : index
    %c36 = arith.constant 36 : index
    %12 = vector.load %arg1[%c0_12, %c0_13, %c36] : memref<1x32x326xbf16, #tpu.memory_space<vmem>>, vector<1x32x288xbf16>
    %13 = vector.shape_cast %12 : vector<1x32x288xbf16> to vector<32x288xbf16>
    %c0_14 = arith.constant 0 : index
    %c0_15 = arith.constant 0 : index
    %c37 = arith.constant 37 : index
    %14 = vector.load %arg1[%c0_14, %c0_15, %c37] : memref<1x32x326xbf16, #tpu.memory_space<vmem>>, vector<1x32x288xbf16>
    %15 = vector.shape_cast %14 : vector<1x32x288xbf16> to vector<32x288xbf16>
    %c0_16 = arith.constant 0 : index
    %c0_17 = arith.constant 0 : index
    %c38 = arith.constant 38 : index
    %16 = vector.load %arg1[%c0_16, %c0_17, %c38] : memref<1x32x326xbf16, #tpu.memory_space<vmem>>, vector<1x32x288xbf16>
    %17 = vector.shape_cast %16 : vector<1x32x288xbf16> to vector<32x288xbf16>
    %18 = tpu.concatenate %1, %3, %5, %7, %9, %11, %13, %15, %17 in 0 : vector<32x288xbf16>, vector<32x288xbf16>, vector<32x288xbf16>, vector<32x288xbf16>, vector<32x288xbf16>, vector<32x288xbf16>, vector<32x288xbf16>, vector<32x288xbf16>, vector<32x288xbf16> -> vector<288x288xbf16>
    %c0_18 = arith.constant 0 : index
    %c0_19 = arith.constant 0 : index
    %19 = vector.load %arg2[%c0_18, %c0_19] : memref<32x288xbf16, #tpu.memory_space<vmem>>, vector<32x288xbf16>
    %cst = arith.constant dense<0.000000e+00> : vector<32x288xf32>
    %20 = tpu.matmul %19, %18, %cst {dimension_numbers = #tpu.dot_dimension_numbers<[1], [0], [0], [1], [0, 0, 1, 1], [], []>} : vector<32x288xbf16>, vector<288x288xbf16>, vector<32x288xf32> -> vector<32x288xf32>
    %c0_20 = arith.constant 0 : index
    %c0_21 = arith.constant 0 : index
    %21 = vector.load %arg3[%c0_20, %c0_21] : memref<32x1xf32, #tpu.memory_space<vmem>>, vector<32x1xf32>
    %22 = vector.broadcast %21 : vector<32x1xf32> to vector<32x288xf32>
    %23 = arith.addf %20, %22 : vector<32x288xf32>
    %c0_22 = arith.constant 0 : index
    %c0_23 = arith.constant 0 : index
    %24 = vector.load %arg5[%c0_22, %c0_23] : memref<1x288xf32, #tpu.memory_space<vmem>>, vector<1x288xf32>
    %25 = vector.broadcast %24 : vector<1x288xf32> to vector<32x288xf32>
    %26 = arith.mulf %23, %25 : vector<32x288xf32>
    %c0_24 = arith.constant 0 : index
    %c0_25 = arith.constant 0 : index
    %27 = vector.load %arg4[%c0_24, %c0_25] : memref<32x32xf32, #tpu.memory_space<vmem>>, vector<32x32xf32>
    %cst_26 = arith.constant dense<0.000000e+00> : vector<32x288xf32>
    %28 = tpu.matmul %27, %26, %cst_26 {dimension_numbers = #tpu.dot_dimension_numbers<[1], [0], [0], [1], [0, 0, 1, 1], [], []>} : vector<32x32xf32>, vector<32x288xf32>, vector<32x288xf32> -> vector<32x288xf32>
    %c0_27 = arith.constant 0 : index
    %c0_28 = arith.constant 0 : index
    %29 = vector.load %arg4[%c0_27, %c0_28] : memref<32x32xf32, #tpu.memory_space<vmem>>, vector<32x32xf32>
    %30 = arith.mulf %26, %26 : vector<32x288xf32>
    %cst_29 = arith.constant dense<0.000000e+00> : vector<32x288xf32>
    %31 = tpu.matmul %29, %30, %cst_29 {dimension_numbers = #tpu.dot_dimension_numbers<[1], [0], [0], [1], [0, 0, 1, 1], [], []>} : vector<32x32xf32>, vector<32x288xf32>, vector<32x288xf32> -> vector<32x288xf32>
    %cst_30 = arith.constant dense<0.000000e+00> : vector<32xf32>
    %32 = vector.multi_reduction <add>, %28, %cst_30 [1] : vector<32x288xf32> to vector<32xf32>
    %33 = vector.shape_cast %32 : vector<32xf32> to vector<32x1xf32>
    %cst_31 = arith.constant 9.765625E-4 : f32
    %34 = vector.broadcast %cst_31 : f32 to vector<32x1xf32>
    %35 = arith.mulf %33, %34 : vector<32x1xf32>
    %cst_32 = arith.constant dense<0.000000e+00> : vector<32xf32>
    %36 = vector.multi_reduction <add>, %31, %cst_32 [1] : vector<32x288xf32> to vector<32xf32>
    %37 = vector.shape_cast %36 : vector<32xf32> to vector<32x1xf32>
    %cst_33 = arith.constant 9.765625E-4 : f32
    %38 = vector.broadcast %cst_33 : f32 to vector<32x1xf32>
    %39 = arith.mulf %37, %38 : vector<32x1xf32>
    %40 = arith.mulf %35, %35 : vector<32x1xf32>
    %41 = arith.subf %39, %40 : vector<32x1xf32>
    %cst_34 = arith.constant 0.000000e+00 : f32
    %42 = vector.broadcast %cst_34 : f32 to vector<32x1xf32>
    %43 = arith.maximumf %41, %42 : vector<32x1xf32>
    %cst_35 = arith.constant 9.99999974E-6 : f32
    %44 = vector.broadcast %cst_35 : f32 to vector<32x1xf32>
    %45 = arith.addf %43, %44 : vector<32x1xf32>
    %46 = math.rsqrt %45 : vector<32x1xf32>
    %47 = vector.broadcast %35 : vector<32x1xf32> to vector<32x288xf32>
    %48 = arith.subf %26, %47 : vector<32x288xf32>
    %49 = vector.broadcast %46 : vector<32x1xf32> to vector<32x288xf32>
    %50 = arith.mulf %48, %49 : vector<32x288xf32>
    %cst_36 = arith.constant 0.000000e+00 : f32
    %51 = vector.broadcast %cst_36 : f32 to vector<32x288xf32>
    %52 = arith.maximumf %50, %51 : vector<32x288xf32>
    %53 = arith.truncf %52 : vector<32x288xf32> to vector<32x288xbf16>
    %c0_37 = arith.constant 0 : index
    %c0_38 = arith.constant 0 : index
    %c0_39 = arith.constant 0 : index
    %54 = vector.load %arg6[%c0_37, %c0_38, %c0_39] : memref<1x32x288xbf16, #tpu.memory_space<vmem>>, vector<1x32x288xbf16>
    %55 = vector.shape_cast %54 : vector<1x32x288xbf16> to vector<32x288xbf16>
    %56 = vector.shape_cast %53 : vector<32x288xbf16> to vector<1x32x288xbf16>
    tpu.vector_store %arg6[%c0_37, %c0_38, %c0_39], %56 {strides = array<i32>} : memref<1x32x288xbf16, #tpu.memory_space<vmem>>, vector<1x32x288xbf16>,
    return
  }
  func.func @transform_0(%arg0: i32) -> (i32, i32, i32) {
    %c0_i32 = arith.constant 0 : i32
    %c0_i32_0 = arith.constant 0 : i32
    %c0_i32_1 = arith.constant 0 : i32
    return %arg0, %c0_i32, %c0_i32_0 : i32, i32, i32
  }
  func.func @transform_1(%arg0: i32) -> (i32, i32) {
    %c0_i32 = arith.constant 0 : i32
    %c0_i32_0 = arith.constant 0 : i32
    %c0_i32_1 = arith.constant 0 : i32
    return %c0_i32, %c0_i32_0 : i32, i32
  }
  func.func @transform_2(%arg0: i32) -> (i32, i32) {
    %c0_i32 = arith.constant 0 : i32
    %c0_i32_0 = arith.constant 0 : i32
    %c0_i32_1 = arith.constant 0 : i32
    return %c0_i32, %c0_i32_0 : i32, i32
  }
  func.func @transform_3(%arg0: i32) -> (i32, i32) {
    %c0_i32 = arith.constant 0 : i32
    %c0_i32_0 = arith.constant 0 : i32
    %c0_i32_1 = arith.constant 0 : i32
    return %c0_i32, %c0_i32_0 : i32, i32
  }
  func.func @transform_4(%arg0: i32) -> (i32, i32) {
    %c0_i32 = arith.constant 0 : i32
    %c0_i32_0 = arith.constant 0 : i32
    %c0_i32_1 = arith.constant 0 : i32
    return %c0_i32, %c0_i32_0 : i32, i32
  }
  func.func @transform_5(%arg0: i32) -> (i32, i32, i32) {
    %c0_i32 = arith.constant 0 : i32
    %c0_i32_0 = arith.constant 0 : i32
    %c0_i32_1 = arith.constant 0 : i32
    return %arg0, %c0_i32, %c0_i32_0 : i32, i32, i32
  }
}

module attributes {stable_mosaic.version = 11 : i64} {
  func.func @kernel(%arg0: i32, %arg1: memref<1x8x1158xbf16, #tpu.memory_space<vmem>>, %arg2: memref<8x72xbf16, #tpu.memory_space<vmem>>, %arg3: memref<8x1xf32, #tpu.memory_space<vmem>>, %arg4: memref<8x8xf32, #tpu.memory_space<vmem>>, %arg5: memref<1x1088xf32, #tpu.memory_space<vmem>>, %arg6: memref<1x8x1088xf32, #tpu.memory_space<vmem>>) attributes {dimension_semantics = [#tpu.dimension_semantics<parallel>], iteration_bounds = array<i64: 2>, scalar_prefetch = 0 : i64, scratch_operands = 0 : i64, tpu.core_type = #tpu.core_type<tc>, window_params = [{transform_indices = @transform_0, window_bounds = array<i64: 1, 8, 1158>}, {pipeline_mode = #tpu.pipeline_mode<synchronous>, transform_indices = @transform_1, window_bounds = array<i64: 8, 72>}, {pipeline_mode = #tpu.pipeline_mode<synchronous>, transform_indices = @transform_2, window_bounds = array<i64: 8, 1>}, {pipeline_mode = #tpu.pipeline_mode<synchronous>, transform_indices = @transform_3, window_bounds = array<i64: 8, 8>}, {pipeline_mode = #tpu.pipeline_mode<synchronous>, transform_indices = @transform_4, window_bounds = array<i64: 1, 1088>}, {transform_indices = @transform_5, window_bounds = array<i64: 1, 8, 1088>}]} {
    %c0 = arith.constant 0 : index
    %c0_0 = arith.constant 0 : index
    %c0_1 = arith.constant 0 : index
    %0 = vector.load %arg1[%c0, %c0_0, %c0_1] : memref<1x8x1158xbf16, #tpu.memory_space<vmem>>, vector<1x8x1088xbf16>
    %1 = vector.shape_cast %0 : vector<1x8x1088xbf16> to vector<8x1088xbf16>
    %c0_2 = arith.constant 0 : index
    %c0_3 = arith.constant 0 : index
    %c1 = arith.constant 1 : index
    %2 = vector.load %arg1[%c0_2, %c0_3, %c1] : memref<1x8x1158xbf16, #tpu.memory_space<vmem>>, vector<1x8x1088xbf16>
    %3 = vector.shape_cast %2 : vector<1x8x1088xbf16> to vector<8x1088xbf16>
    %c0_4 = arith.constant 0 : index
    %c0_5 = arith.constant 0 : index
    %c2 = arith.constant 2 : index
    %4 = vector.load %arg1[%c0_4, %c0_5, %c2] : memref<1x8x1158xbf16, #tpu.memory_space<vmem>>, vector<1x8x1088xbf16>
    %5 = vector.shape_cast %4 : vector<1x8x1088xbf16> to vector<8x1088xbf16>
    %c0_6 = arith.constant 0 : index
    %c0_7 = arith.constant 0 : index
    %c34 = arith.constant 34 : index
    %6 = vector.load %arg1[%c0_6, %c0_7, %c34] : memref<1x8x1158xbf16, #tpu.memory_space<vmem>>, vector<1x8x1088xbf16>
    %7 = vector.shape_cast %6 : vector<1x8x1088xbf16> to vector<8x1088xbf16>
    %c0_8 = arith.constant 0 : index
    %c0_9 = arith.constant 0 : index
    %c35 = arith.constant 35 : index
    %8 = vector.load %arg1[%c0_8, %c0_9, %c35] : memref<1x8x1158xbf16, #tpu.memory_space<vmem>>, vector<1x8x1088xbf16>
    %9 = vector.shape_cast %8 : vector<1x8x1088xbf16> to vector<8x1088xbf16>
    %c0_10 = arith.constant 0 : index
    %c0_11 = arith.constant 0 : index
    %c36 = arith.constant 36 : index
    %10 = vector.load %arg1[%c0_10, %c0_11, %c36] : memref<1x8x1158xbf16, #tpu.memory_space<vmem>>, vector<1x8x1088xbf16>
    %11 = vector.shape_cast %10 : vector<1x8x1088xbf16> to vector<8x1088xbf16>
    %c0_12 = arith.constant 0 : index
    %c0_13 = arith.constant 0 : index
    %c68 = arith.constant 68 : index
    %12 = vector.load %arg1[%c0_12, %c0_13, %c68] : memref<1x8x1158xbf16, #tpu.memory_space<vmem>>, vector<1x8x1088xbf16>
    %13 = vector.shape_cast %12 : vector<1x8x1088xbf16> to vector<8x1088xbf16>
    %c0_14 = arith.constant 0 : index
    %c0_15 = arith.constant 0 : index
    %c69 = arith.constant 69 : index
    %14 = vector.load %arg1[%c0_14, %c0_15, %c69] : memref<1x8x1158xbf16, #tpu.memory_space<vmem>>, vector<1x8x1088xbf16>
    %15 = vector.shape_cast %14 : vector<1x8x1088xbf16> to vector<8x1088xbf16>
    %c0_16 = arith.constant 0 : index
    %c0_17 = arith.constant 0 : index
    %c70 = arith.constant 70 : index
    %16 = vector.load %arg1[%c0_16, %c0_17, %c70] : memref<1x8x1158xbf16, #tpu.memory_space<vmem>>, vector<1x8x1088xbf16>
    %17 = vector.shape_cast %16 : vector<1x8x1088xbf16> to vector<8x1088xbf16>
    %18 = tpu.concatenate %1, %3, %5, %7, %9, %11, %13, %15, %17 in 0 : vector<8x1088xbf16>, vector<8x1088xbf16>, vector<8x1088xbf16>, vector<8x1088xbf16>, vector<8x1088xbf16>, vector<8x1088xbf16>, vector<8x1088xbf16>, vector<8x1088xbf16>, vector<8x1088xbf16> -> vector<72x1088xbf16>
    %c0_18 = arith.constant 0 : index
    %c0_19 = arith.constant 0 : index
    %19 = vector.load %arg2[%c0_18, %c0_19] : memref<8x72xbf16, #tpu.memory_space<vmem>>, vector<8x72xbf16>
    %cst = arith.constant dense<0.000000e+00> : vector<8x1088xf32>
    %20 = tpu.matmul %19, %18, %cst {dimension_numbers = #tpu.dot_dimension_numbers<[1], [0], [0], [1], [0, 0, 1, 1], [], []>} : vector<8x72xbf16>, vector<72x1088xbf16>, vector<8x1088xf32> -> vector<8x1088xf32>
    %c0_20 = arith.constant 0 : index
    %c0_21 = arith.constant 0 : index
    %21 = vector.load %arg3[%c0_20, %c0_21] : memref<8x1xf32, #tpu.memory_space<vmem>>, vector<8x1xf32>
    %22 = vector.broadcast %21 : vector<8x1xf32> to vector<8x1088xf32>
    %23 = arith.addf %20, %22 : vector<8x1088xf32>
    %c0_22 = arith.constant 0 : index
    %c0_23 = arith.constant 0 : index
    %24 = vector.load %arg5[%c0_22, %c0_23] : memref<1x1088xf32, #tpu.memory_space<vmem>>, vector<1x1088xf32>
    %25 = vector.broadcast %24 : vector<1x1088xf32> to vector<8x1088xf32>
    %26 = arith.mulf %23, %25 : vector<8x1088xf32>
    %c0_24 = arith.constant 0 : index
    %c0_25 = arith.constant 0 : index
    %27 = vector.load %arg4[%c0_24, %c0_25] : memref<8x8xf32, #tpu.memory_space<vmem>>, vector<8x8xf32>
    %cst_26 = arith.constant dense<0.000000e+00> : vector<8x1088xf32>
    %28 = tpu.matmul %27, %26, %cst_26 {dimension_numbers = #tpu.dot_dimension_numbers<[1], [0], [0], [1], [0, 0, 1, 1], [], []>} : vector<8x8xf32>, vector<8x1088xf32>, vector<8x1088xf32> -> vector<8x1088xf32>
    %c0_27 = arith.constant 0 : index
    %c0_28 = arith.constant 0 : index
    %29 = vector.load %arg4[%c0_27, %c0_28] : memref<8x8xf32, #tpu.memory_space<vmem>>, vector<8x8xf32>
    %30 = arith.mulf %26, %26 : vector<8x1088xf32>
    %cst_29 = arith.constant dense<0.000000e+00> : vector<8x1088xf32>
    %31 = tpu.matmul %29, %30, %cst_29 {dimension_numbers = #tpu.dot_dimension_numbers<[1], [0], [0], [1], [0, 0, 1, 1], [], []>} : vector<8x8xf32>, vector<8x1088xf32>, vector<8x1088xf32> -> vector<8x1088xf32>
    %cst_30 = arith.constant dense<0.000000e+00> : vector<8xf32>
    %32 = vector.multi_reduction <add>, %28, %cst_30 [1] : vector<8x1088xf32> to vector<8xf32>
    %33 = vector.shape_cast %32 : vector<8xf32> to vector<8x1xf32>
    %cst_31 = arith.constant 2.44140625E-4 : f32
    %34 = vector.broadcast %cst_31 : f32 to vector<8x1xf32>
    %35 = arith.mulf %33, %34 : vector<8x1xf32>
    %cst_32 = arith.constant dense<0.000000e+00> : vector<8xf32>
    %36 = vector.multi_reduction <add>, %31, %cst_32 [1] : vector<8x1088xf32> to vector<8xf32>
    %37 = vector.shape_cast %36 : vector<8xf32> to vector<8x1xf32>
    %cst_33 = arith.constant 2.44140625E-4 : f32
    %38 = vector.broadcast %cst_33 : f32 to vector<8x1xf32>
    %39 = arith.mulf %37, %38 : vector<8x1xf32>
    %40 = arith.mulf %35, %35 : vector<8x1xf32>
    %41 = arith.subf %39, %40 : vector<8x1xf32>
    %cst_34 = arith.constant 0.000000e+00 : f32
    %42 = vector.broadcast %cst_34 : f32 to vector<8x1xf32>
    %43 = arith.maximumf %41, %42 : vector<8x1xf32>
    %cst_35 = arith.constant 9.99999974E-6 : f32
    %44 = vector.broadcast %cst_35 : f32 to vector<8x1xf32>
    %45 = arith.addf %43, %44 : vector<8x1xf32>
    %46 = math.rsqrt %45 : vector<8x1xf32>
    %47 = vector.broadcast %35 : vector<8x1xf32> to vector<8x1088xf32>
    %48 = arith.subf %26, %47 : vector<8x1088xf32>
    %49 = vector.broadcast %46 : vector<8x1xf32> to vector<8x1088xf32>
    %50 = arith.mulf %48, %49 : vector<8x1088xf32>
    %cst_36 = arith.constant 0.000000e+00 : f32
    %51 = vector.broadcast %cst_36 : f32 to vector<8x1088xf32>
    %52 = arith.maximumf %50, %51 : vector<8x1088xf32>
    %c0_37 = arith.constant 0 : index
    %c0_38 = arith.constant 0 : index
    %c0_39 = arith.constant 0 : index
    %53 = vector.load %arg6[%c0_37, %c0_38, %c0_39] : memref<1x8x1088xf32, #tpu.memory_space<vmem>>, vector<1x8x1088xf32>
    %54 = vector.shape_cast %53 : vector<1x8x1088xf32> to vector<8x1088xf32>
    %55 = vector.shape_cast %52 : vector<8x1088xf32> to vector<1x8x1088xf32>
    tpu.vector_store %arg6[%c0_37, %c0_38, %c0_39], %55 {strides = array<i32>} : memref<1x8x1088xf32, #tpu.memory_space<vmem>>, vector<1x8x1088xf32>,
    return
  }
  func.func @transform_0(%arg0: i32) -> (i32, i32, i32) {
    %c0_i32 = arith.constant 0 : i32
    %c0_i32_0 = arith.constant 0 : i32
    %c0_i32_1 = arith.constant 0 : i32
    return %arg0, %c0_i32, %c0_i32_0 : i32, i32, i32
  }
  func.func @transform_1(%arg0: i32) -> (i32, i32) {
    %c0_i32 = arith.constant 0 : i32
    %c0_i32_0 = arith.constant 0 : i32
    %c0_i32_1 = arith.constant 0 : i32
    return %c0_i32, %c0_i32_0 : i32, i32
  }
  func.func @transform_2(%arg0: i32) -> (i32, i32) {
    %c0_i32 = arith.constant 0 : i32
    %c0_i32_0 = arith.constant 0 : i32
    %c0_i32_1 = arith.constant 0 : i32
    return %c0_i32, %c0_i32_0 : i32, i32
  }
  func.func @transform_3(%arg0: i32) -> (i32, i32) {
    %c0_i32 = arith.constant 0 : i32
    %c0_i32_0 = arith.constant 0 : i32
    %c0_i32_1 = arith.constant 0 : i32
    return %c0_i32, %c0_i32_0 : i32, i32
  }
  func.func @transform_4(%arg0: i32) -> (i32, i32) {
    %c0_i32 = arith.constant 0 : i32
    %c0_i32_0 = arith.constant 0 : i32
    %c0_i32_1 = arith.constant 0 : i32
    return %c0_i32, %c0_i32_0 : i32, i32
  }
  func.func @transform_5(%arg0: i32) -> (i32, i32, i32) {
    %c0_i32 = arith.constant 0 : i32
    %c0_i32_0 = arith.constant 0 : i32
    %c0_i32_1 = arith.constant 0 : i32
    return %arg0, %c0_i32, %c0_i32_0 : i32, i32, i32
  }
}

</mosaic_0001>

<bundles_post_ra>
// kernel: decoder_block_forward.2
= control target key start
LH: loop header
LB: loop body
LE: loop exit
PB: predicated region body
PF: predicated region fallthrough
CT: control target
= control target key end

     0   :  { %s1311_s18 = smov 0   ;;  %s1822_s0 = inlined_call_operand.vmem [shape: bf16[2,32,326], index: 0, kind: input, shape index: {}]   ;;  %s1823_s1 = inlined_call_operand.vmem [shape: bf16[32,288], index: 1, kind: input, shape index: {}]   ;;  %s1824_s2 = inlined_call_operand.vmem [shape: f32[32,1], index: 2, kind: input, shape index: {}]   ;;  %s1825_s3 = inlined_call_operand.vmem [shape: f32[32,32], index: 3, kind: input, shape index: {}]   ;;  %s1826_s4 = inlined_call_operand.vmem [shape: f32[1,288], index: 4, kind: input, shape index: {}]   ;;  %s1827_s5 = inlined_call_operand.vmem [shape: bf16[2,32,288], index: 5, kind: output, shape index: {}]  }
   0x1 LB: > { %s1124_s19 = sadd.s32 4294967295, %s1270_s18   ;;  %p1128_p0 = scmp.ge.s32.totalorder %s1270_s18, 1  ;;  %s1270_s18 = sphi %s1311_s18, %s15_s18  }
   0x2   : > { %p187_p1 = scmp.lt.s32.totalorder %s1270_s18, 3 }
   0x4   : > { %p188_p2 = pnand %p1128_p0, %p187_p1 }
   0x5   : > { %p215_p3 = scmp.lt.s32.totalorder (!%p188_p2), %s1124_s19, 1  ;;  %s1272_s24 = smov (!%p188_p2), 126  }
   0x6   : > { %191 = sbr.rel (%p188_p2) target bundleno = 766 (0x2fe), region = 40  ;;  %s1273_s25 = smov (!%p188_p2), 110  }
   0x7   : > { %s1274_s26 = smov (!%p188_p2), 90   ;;  %s1275_s27 = smov (!%p188_p2), 127  }
   0x8   : > { %s1276_s28 = smov (!%p188_p2), 91   ;;  %s1277_s29 = smov (!%p188_p2), 92  }
   0x9   : > { %s1278_s30 = smov (!%p188_p2), 108   ;;  %s1279_s6 = smov (!%p188_p2), 109  }
   0xb   : > { %s1829_s19 = smov (!%p215_p3, %s1124_s19), 1  ;;  %vm324_vm0 = vcmask 900096   ;;  %vm301_vm1 = vcmask 1031168   ;;  %vm439_vm2 = vcmask 736256   ;;  %vm278_vm3 = vcmask 1039360  }
   0xc   : > { %s1235_s20 = smul.u32 48, %s1829_s19  ;;  %vm416_vm4 = vcmask 744448   ;;  %v1165_v47 = vld [vmem:[%s1823_s1 + $0x8] sm:$0xf]  ;;  %v1219_v48 = vld [vmem:[%s1823_s1 + $0x10] sm:$0xf0] }
   0xd   : > { %v1453_v49 = vor.u32 %v1219_v48, %v1165_v47  ;;  %vm512_vm5 = vcmask 261120   ;;  %v1177_v59 = vld [vmem:[%s1823_s1 + $0x20] sm:$0xf]  ;;  %v1222_v60 = vld [vmem:[%s1823_s1 + $0x28] sm:$0xf0]  ;;  %vm393_vm6 = vcmask 752640  }
   0xe   : > { %s1327_s23 = scalar_lea.vmem %s1822_s0, %s1235_s20  ;;  %v1485_v61 = vor.u32 %v1222_v60, %v1177_v59  ;;  %v1157_v63 = vld [vmem:[%s1823_s1] sm:$0xf]  ;;  %vm370_vm7 = vcmask 883712   ;;  %vm347_vm8 = vcmask 891904   ;;  %s1787_s7 = scalar_lea.vmem %s1827_s5, %s1235_s20  ;;  %vm1061_vm13 = vcmask 257024  }
   0xf   : > { %v1145_v0 = vld [vmem:[%s1327_s23 + $0x18] sm:$0xf]  ;;  %v1215_v1 = vld [vmem:[%s1327_s23 + $0x20] sm:$0xf0]  ;;  %v1133_v2 = vld [vmem:[%s1327_s23] sm:$0xf] }
  0x10   : > { %v1332_v3 = vor.u32 %v1215_v1, %v1145_v0  ;;  %v1212_v4 = vld [vmem:[%s1327_s23 + $0x8] sm:$0xf0]  ;;  %v1214_v6 = vld [vmem:[%s1327_s23 + $0x1c] sm:$0xf]  ;;  %v1147_v7 = vld [vmem:[%s1327_s23 + $0x24] sm:$0xf0] }
  0x11   : > { %v1335_v5 = vor.u32 %v1212_v4, %v1133_v2  ;;  %v1211_v8 = vld [vmem:[%s1327_s23 + $0x4] sm:$0xf]  ;;  %v1135_v9 = vld [vmem:[%s1327_s23 + $0xc] sm:$0xf0]  ;;  %v1347_v10 = vor.u32 %v1214_v6, %v1147_v7  ;;  %v1153_v12 = vld [vmem:[%s1327_s23 + $0x20] sm:$0xf] }
  0x12   : > { %295 = vrot.lane.b32.xlu2 %v1332_v3, %s1272_s24  ;;  %318 = vrot.lane.b32.xlu0 %v1332_v3, %s1273_s25  ;;  %v1349_v11 = vor.u32 %v1211_v8, %v1135_v9  ;;  %v1216_v13 = vld [vmem:[%s1327_s23 + $0x28] sm:$0xf0]  ;;  %v1141_v15 = vld [vmem:[%s1327_s23 + $0x8] sm:$0xf] }
  0x13   : > { %312 = vrot.lane.b32.xlu1 %v1335_v5, %s1273_s25  ;;  %v1371_v14 = vor.u32 %v1216_v13, %v1153_v12  ;;  %v1213_v16 = vld [vmem:[%s1327_s23 + $0x10] sm:$0xf0]  ;;  %v1218_v0 = vld [vmem:[%s1823_s1 + $0x8] sm:$0xf0] }
  0x14   : > { %v1382_v17 = vor.u32 %v1213_v16, %v1141_v15  ;;  %v1499_v2 = vor.u32 %v1218_v0, %v1157_v63  ;;  %v1280_v15 = vmov 0   ;;  %v460_v16 = vld [vmem:[%s1824_s2 + $0x10] sm:$0xff] }
  0x15   : > { %1254 = vset.pattern.permute.xlu1 %v1280_v15  ;;  %1253 = vset.pattern.permute.xlu0 %v1280_v15 }
  0x16   : > { %1255 = vset.pattern.permute.xlu2 %v1280_v15 }
  0x1a   : > { %297 = vrot.lane.b32.xlu2 %v1347_v10, %s1272_s24  ;;  %320 = vrot.lane.b32.xlu0 %v1347_v10, %s1273_s25 }
  0x1b   : > { %314 = vrot.lane.b32.xlu1 %v1349_v11, %s1273_s25 }
  0x22   : > { %433 = vrot.lane.b32.xlu0 %v1332_v3, %s1274_s26  ;;  %289 = vrot.lane.b32.xlu2 %v1335_v5, %s1272_s24 }
  0x23   : > { %435 = vrot.lane.b32.xlu1 %v1347_v10, %s1274_s26 }
  0x2a   : > { %429 = vrot.lane.b32.xlu2 %v1349_v11, %s1274_s26  ;;  %291 = vrot.lane.b32.xlu0 %v1349_v11, %s1272_s24 }
  0x2b   : > { %427 = vrot.lane.b32.xlu1 %v1335_v5, %s1274_s26 }
  0x32   : > { %322 = vrot.lane.b32.xlu2 %v1371_v14, %s1273_s25  ;;  %272 = vrot.lane.b32.xlu0 %v1332_v3, %s1275_s27 }
  0x33   : > { %274 = vrot.lane.b32.xlu1 %v1347_v10, %s1275_s27 }
  0x3a   : > { %266 = vrot.lane.b32.xlu2 %v1335_v5, %s1275_s27  ;;  %412 = vrot.lane.b32.xlu0 %v1347_v10, %s1276_s28 }
  0x3b   : > { %414 = vrot.lane.b32.xlu1 %v1371_v14, %s1276_s28 }
  0x42   : > { %406 = vrot.lane.b32.xlu2 %v1349_v11, %s1276_s28  ;;  %268 = vrot.lane.b32.xlu0 %v1349_v11, %s1275_s27 }
  0x43   : > { %316 = vrot.lane.b32.xlu1 %v1382_v17, %s1273_s25 }
  0x4a   : > { %389 = vrot.lane.b32.xlu2 %v1347_v10, %s1277_s29  ;;  %408 = vrot.lane.b32.xlu0 %v1382_v17, %s1276_s28 }
  0x4b   : > { %299 = vrot.lane.b32.xlu1 %v1371_v14, %s1272_s24 }
  0x52   : > { %383 = vrot.lane.b32.xlu2 %v1349_v11, %s1277_s29  ;;  %391 = vrot.lane.b32.xlu0 %v1371_v14, %s1277_s29 }
  0x53   : > { %293 = vrot.lane.b32.xlu1 %v1382_v17, %s1272_s24 }
  0x5a   : > { %276 = vrot.lane.b32.xlu2 %v1371_v14, %s1275_s27  ;;  %385 = vrot.lane.b32.xlu0 %v1382_v17, %s1277_s29 }
  0x5b   : > { %410 = vrot.lane.b32.xlu1 %v1332_v3, %s1276_s28 }
  0x62   : > { %404 = vrot.lane.b32.xlu2 %v1335_v5, %s1276_s28  ;;  %366 = vrot.lane.b32.xlu0 %v1347_v10, %s1278_s30 }
  0x63   : > { %368 = vrot.lane.b32.xlu1 %v1371_v14, %s1278_s30 }
  0x6a   : > { %362 = vrot.lane.b32.xlu2 %v1382_v17, %s1278_s30  ;;  %270 = vrot.lane.b32.xlu0 %v1382_v17, %s1275_s27 }
  0x6b   : > { %360 = vrot.lane.b32.xlu1 %v1349_v11, %s1278_s30 }
  0x6c   : > { %v296_v18 = vpop.permute.xlu2 %295 }
  0x72   : > { %345 = vrot.lane.b32.xlu2 %v1371_v14, %s1279_s6  ;;  %387 = vrot.lane.b32.xlu0 %v1332_v3, %s1277_s29 }
  0x73   : > { %343 = vrot.lane.b32.xlu1 %v1347_v10, %s1279_s6 }
  0x74   : > { %v1408_v19 = vpop.permute.xlu2 %297 }
  0x75   : > { %v304_v32 = vsel %vm301_vm1, %v296_v18, %v1408_v19 }
  0x7a   : > { %339 = vrot.lane.b32.xlu2 %v1382_v17, %s1279_s6  ;;  %381 = vrot.lane.b32.xlu0 %v1335_v5, %s1277_s29 }
  0x7b   : > { %337 = vrot.lane.b32.xlu1 %v1349_v11, %s1279_s6 }
  0x7c   : > { %v290_v20 = vpop.permute.xlu2 %289 }
  0x82   : > { %341 = vrot.lane.b32.xlu2 %v1332_v3, %s1279_s6  ;;  %364 = vrot.lane.b32.xlu0 %v1332_v3, %s1278_s30 }
  0x83   : > { %358 = vrot.lane.b32.xlu1 %v1335_v5, %s1278_s30 }
  0x84   : > { %v319_v21 = vpop.permute.xlu0 %318  ;;  %v1416_v22 = vpop.permute.xlu2 %429 }
  0x85   : > { %v313_v23 = vpop.permute.xlu1 %312 }
  0x8a   : > { %431 = vrot.lane.b32.xlu2 %v1382_v17, %s1274_s26  ;;  %437 = vrot.lane.b32.xlu0 %v1371_v14, %s1274_s26 }
  0x8b   : > { %335 = vrot.lane.b32.xlu1 %v1335_v5, %s1279_s6 }
  0x8c   : > { %v321_v24 = vpop.permute.xlu0 %320  ;;  %v1423_v25 = vpop.permute.xlu2 %322 }
  0x8d   : > { %v315_v26 = vpop.permute.xlu1 %314  ;;  %v327_v27 = vsel %vm324_vm0, %v319_v21, %v321_v24  ;;  %v328_v28 = vsel %vm324_vm0, %v321_v24, %v1423_v25 }
  0x8e   : > { %519 = vmatpush.bf16.msra.mxu0 %v327_v27  ;;  %576 = vmatpush.bf16.msra.mxu3 %v328_v28  ;;  %v325_v29 = vsel %vm324_vm0, %v313_v23, %v315_v26  ;;  %v458_v28 = vld [vmem:[%s1824_s2] sm:$0xff] }
  0x92   : > { %520 = vmatpush.bf16.msra.mxu0 %v325_v29 }
  0x93   : > { %474 = vperm.xlu1 %1254, %v460_v16  }
  0x94   : > { %v434_v30 = vpop.permute.xlu0 %433  ;;  %v267_v34 = vpop.permute.xlu2 %266 }
  0x95   : > { %v1429_v31 = vpop.permute.xlu1 %435 }
  0x96   : > { %521 = vmatpush.bf16.msra.mxu0 %v304_v32  ;;  %v442_v33 = vsel %vm439_vm2, %v434_v30, %v1429_v31 }
  0x97   : > { %563 = vmatpush.bf16.msra.mxu2 %v442_v33 }
  0x9b   : > { %464 = vperm.xlu1 %1254, %v458_v28  }
  0x9c   : > { %v292_v35 = vpop.permute.xlu0 %291  ;;  %v1438_v39 = vpop.permute.xlu2 %406 }
  0x9d   : > { %v428_v36 = vpop.permute.xlu1 %427  ;;  %v302_v37 = vsel %vm301_vm1, %v290_v20, %v292_v35  ;;  %v1221_v20 = vld [vmem:[%s1823_s1 + $0x20] sm:$0xf0] }
  0x9e   : > { %522 = vmatpush.bf16.msra.mxu0 %v302_v37  ;;  %v440_v38 = vsel %vm439_vm2, %v428_v36, %v1416_v22 }
  0x9f   : > { %564 = vmatpush.bf16.msra.mxu2 %v440_v38 }
  0xa2   : > { %1179 = vmatmul.msk.bf16.vlgmr.msra.gmra.mxu2 %vm512_vm5, %v1453_v49 }
  0xa4   : > { %v273_v40 = vpop.permute.xlu0 %272  ;;  %v1443_v45 = vpop.permute.xlu2 %389 }
  0xa5   : > { %v275_v41 = vpop.permute.xlu1 %274 }
  0xa6   : > { %v281_v42 = vsel %vm278_vm3, %v273_v40, %v275_v41  ;;  %v1217_v40 = vld [vmem:[%s1823_s1 + $0x4] sm:$0xf] }
  0xa7   : > { %523 = vmatpush.bf16.msra.mxu0 %v281_v42 }
  0xac   : > { %v413_v43 = vpop.permute.xlu0 %412  ;;  %v1465_v54 = vpop.permute.xlu2 %383 }
  0xad   : > { %v1441_v44 = vpop.permute.xlu1 %414 }
  0xae   : > { %v420_v46 = vsel %vm416_vm4, %v413_v43, %v1441_v44 }
  0xaf   : > { %595 = vmatpush.bf16.msrb.mxu2 %v420_v46  ;;  %v459_v46 = vld [vmem:[%s1824_s2 + $0x8] sm:$0xff] }
  0xb0   : > { %469 = vperm.xlu2 %1255, %v459_v46  }
  0xb2   : > { %1180 = vmatmul.msk.bf16.gmra.mxu2 %vm512_vm5, %v1485_v61 }
  0xb4   : > { %v1457_v50 = vpop.permute.xlu0 %268  ;;  %v1487_v62 = vpop.permute.xlu2 %276 }
  0xb5   : > { %v1459_v51 = vpop.permute.xlu1 %316  ;;  %v279_v52 = vsel %vm278_vm3, %v267_v34, %v1457_v50  ;;  %v282_v6 = vsel %vm278_vm3, %v275_v41, %v1487_v62 }
  0xb6   : > { %524 = vmatpush.bf16.msra.mxu0 %v279_v52  ;;  %v326_v53 = vsel %vm324_vm0, %v315_v26, %v1459_v51 }
  0xb7   : > { %577 = vmatpush.bf16.msra.mxu3 %v326_v53 }
  0xba   : > { %525 = vmatpush.bf16.msra.mxu0 %v1332_v3 }
  0xbc   : > { %v1468_v55 = vpop.permute.xlu0 %408  ;;  %v405_v7 = vpop.permute.xlu2 %404 }
  0xbd   : > { %v1470_v56 = vpop.permute.xlu1 %299  ;;  %v418_v57 = vsel %vm416_vm4, %v1438_v39, %v1468_v55  ;;  %v417_v18 = vsel %vm416_vm4, %v405_v7, %v1438_v39 }
  0xbe   : > { %v305_v58 = vsel %vm301_vm1, %v1408_v19, %v1470_v56  ;;  %596 = vmatpush.bf16.msrb.mxu2 %v418_v57  ;;  %526 = vmatpush.bf16.msra.mxu0 %v1335_v5  ;;  %v1169_v19 = vld [vmem:[%s1823_s1 + $0x18] sm:$0xf]  ;;  %v1171_v57 = vld [vmem:[%s1823_s1 + $0x24] sm:$0xf0] }
  0xbf   : > { %578 = vmatpush.bf16.msra.mxu3 %v305_v58  ;;  %v1525_v23 = vor.u32 %v1221_v20, %v1169_v19 }
  0xc1   : > { %527 = vmatmul.bf16.vlgmr.msra.gmra.mxu0 %v1499_v2 }
  0xc4   : > { %v1497_v1 = vpop.permute.xlu0 %391  ;;  %v363_v26 = vpop.permute.xlu2 %362 }
  0xc5   : > { %v1501_v3 = vpop.permute.xlu1 %293  ;;  %v397_v4 = vsel %vm393_vm6, %v1443_v45, %v1497_v1 }
  0xc6   : > { %v303_v5 = vsel %vm301_vm1, %v292_v35, %v1501_v3  ;;  %597 = vmatpush.bf16.msrb.mxu2 %v397_v4 }
  0xc7   : > { %579 = vmatpush.bf16.msra.mxu3 %v303_v5 }
  0xcb   : > { %580 = vmatpush.bf16.msra.mxu3 %v282_v6 }
  0xcc   : > { %v386_v8 = vpop.permute.xlu0 %385  ;;  %v346_v34 = vpop.permute.xlu2 %345 }
  0xcd   : > { %v411_v9 = vpop.permute.xlu1 %410  ;;  %v395_v12 = vsel %vm393_vm6, %v1465_v54, %v386_v8 }
  0xce   : > { %v419_v13 = vsel %vm416_vm4, %v411_v9, %v413_v43  ;;  %598 = vmatpush.bf16.msrb.mxu2 %v395_v12 }
  0xcf   : > { %538 = vmatpush.bf16.msra.mxu1 %v419_v13 }
  0xd1   : > { %532 = vmatmul.bf16.gmra.mxu0 %v1525_v23 }
  0xd3   : > { %539 = vmatpush.bf16.msra.mxu1 %v417_v18 }
  0xd4   : > { %v367_v21 = vpop.permute.xlu0 %366  ;;  %v340_v39 = vpop.permute.xlu2 %339 }
  0xd5   : > { %v369_v24 = vpop.permute.xlu1 %368 }
  0xd6   : > { %v374_v27 = vsel %vm370_vm7, %v367_v21, %v369_v24 }
  0xd7   : > { %599 = vmatpush.bf16.msrb.mxu2 %v374_v27 }
  0xdc   : > { %v1532_v29 = vpop.permute.xlu0 %270  ;;  %v342_v47 = vpop.permute.xlu2 %341 }
  0xdd   : > { %v361_v30 = vpop.permute.xlu1 %360  ;;  %v280_v32 = vsel %vm278_vm3, %v1457_v50, %v1532_v29 }
  0xde   : > { %581 = vmatpush.bf16.msra.mxu3 %v280_v32  ;;  %v372_v33 = vsel %vm370_vm7, %v361_v30, %v363_v26 }
  0xdf   : > { %600 = vmatpush.bf16.msrb.mxu2 %v372_v33 }
  0xe2   : > { %582 = vmatpush.bf16.msra.mxu3 %v1347_v10  ;;  %v461_v10 = vld [vmem:[%s1824_s2 + $0x18] sm:$0xff] }
  0xe3   : > { %479 = vperm.xlu0 %1253, %v461_v10  }
  0xe4   : > { %v388_v35 = vpop.permute.xlu0 %387  ;;  %v432_v60 = vpop.permute.xlu2 %431 }
  0xe5   : > { %v344_v36 = vpop.permute.xlu1 %343  ;;  %v396_v37 = vsel %vm393_vm6, %v388_v35, %v1443_v45  ;;  %v441_v4 = vsel %vm439_vm2, %v1416_v22, %v432_v60 }
  0xe6   : > { %540 = vmatpush.bf16.msra.mxu1 %v396_v37  ;;  %583 = vmatpush.bf16.msra.mxu3 %v1349_v11  ;;  %v351_v38 = vsel %vm347_vm8, %v344_v36, %v346_v34  ;;  %v1159_v11 = vld [vmem:[%s1823_s1 + $0xc] sm:$0xf0]  ;;  %v350_v58 = vsel %vm347_vm8, %v342_v47, %v344_v36 }
  0xe7   : > { %601 = vmatpush.bf16.msrb.mxu2 %v351_v38  ;;  %v1162_v45 = vor.u32 %v1217_v40, %v1159_v11 }
  0xe9   : > { %584 = vmatmul.bf16.vlgmr.msra.gmra.mxu3 %v1499_v2 }
  0xea   : > { %652 = vmatpush.bf16.msrb.mxu3 %v1441_v44 }
  0xec   : > { %v382_v41 = vpop.permute.xlu0 %381 }
  0xed   : > { %v338_v42 = vpop.permute.xlu1 %337  ;;  %v394_v43 = vsel %vm393_vm6, %v382_v41, %v1465_v54 }
  0xee   : > { %653 = vmatpush.bf16.msrb.mxu3 %v1468_v55  ;;  %541 = vmatpush.bf16.msra.mxu1 %v394_v43  ;;  %v349_v44 = vsel %vm347_vm8, %v338_v42, %v340_v39  ;;  %v1220_v55 = vld [vmem:[%s1823_s1 + $0x1c] sm:$0xf] }
  0xef   : > { %602 = vmatpush.bf16.msrb.mxu2 %v349_v44  ;;  %v1174_v0 = vor.u32 %v1220_v55, %v1171_v57 }
  0xf2   : > { %654 = vmatpush.bf16.msrb.mxu3 %v1497_v1  ;;  %603 = vmatmul.bf16.vlgmr.msrb.gmra.mxu2 %v1162_v45 }
  0xf4   : > { %v365_v48 = vpop.permute.xlu0 %364 }
  0xf5   : > { %v359_v50 = vpop.permute.xlu1 %358  ;;  %v373_v52 = vsel %vm370_vm7, %v365_v48, %v367_v21 }
  0xf6   : > { %655 = vmatpush.bf16.msrb.mxu3 %v386_v8  ;;  %542 = vmatpush.bf16.msra.mxu1 %v373_v52  ;;  %v371_v53 = vsel %vm370_vm7, %v359_v50, %v361_v30 }
  0xf9   : > { %589 = vmatmul.bf16.gmra.mxu3 %v1525_v23 }
  0xfa   : > { %656 = vmatpush.bf16.msrb.mxu3 %v369_v24  ;;  %543 = vmatpush.bf16.msra.mxu1 %v371_v53 }
  0xfc   : > { %v438_v54 = vpop.permute.xlu0 %437 }
  0xfd   : > { %v443_v59 = vsel %vm439_vm2, %v1429_v31, %v438_v54  ;;  %677 = vmatpush.bf16.msra.mxu2 %v438_v54  ;;  %v336_v63 = vpop.permute.xlu1 %335 }
  0xfe   : > { %657 = vmatpush.bf16.msrb.mxu3 %v363_v26  ;;  %544 = vmatpush.bf16.msra.mxu1 %v350_v58  ;;  %v348_v1 = vsel %vm347_vm8, %v336_v63, %v338_v42 }
  0xff   : > { %620 = vmatpush.bf16.msrb.mxu0 %v443_v59 }
 0x101   : > { %678 = vmatpush.bf16.msra.mxu2 %v432_v60 }
 0x102   : > { %658 = vmatpush.bf16.msrb.mxu3 %v346_v34  ;;  %545 = vmatpush.bf16.msra.mxu1 %v348_v1  ;;  %v1627_v34 = vld [vmem:[%s1826_s4] sm:$0x7] }
 0x103   : > { %621 = vmatpush.bf16.msrb.mxu0 %v441_v4  ;;  %608 = vmatmul.bf16.gmra.mxu2 %v1174_v0  ;;  %v693_v43 = vperm.slane %v1627_v34, 1  ;;  %v692_v47 = vperm.slane %v1627_v34, 0 }
 0x105   : > { %546 = vmatmul.bf16.vlgmr.msra.gmra.mxu1 %v1162_v45  ;;  %v1605_v15 = vpop.permute.xlu1 %474 }
 0x106   : > { %1223 = vmatpush.bf16.msrb.mxu1 %v1423_v25  ;;  %659 = vmatpush.bf16.msrb.mxu3 %v340_v39 }
 0x107   : > { %633 = vmatpush.bf16.msra.mxu0 %v1423_v25 }
 0x108   : > { %1181 = vmatmul.msk.bf16.vlgmr.msrb.gmra.mxu0 %vm512_vm5, %v1453_v49 }
 0x109   : > { %660 = vmatmul.bf16.vlgmr.msrb.gmra.mxu3 %v1162_v45 }
 0x10a   : > { %1224 = vmatpush.bf16.msrb.mxu1 %v1459_v51  ;;  %v1612_v24 = vpop.permute.xlu2 %469 }
 0x10b   : > { %634 = vmatpush.bf16.msra.mxu0 %v1459_v51 }
 0x10e   : > { %1225 = vmatpush.bf16.msrb.mxu1 %v1470_v56 }
 0x10f   : > { %635 = vmatpush.bf16.msra.mxu0 %v1470_v56 }
 0x112   : > { %1226 = vmatpush.bf16.msrb.mxu1 %v1501_v3 }
 0x113   : > { %636 = vmatpush.bf16.msra.mxu0 %v1501_v3  ;;  %1183 = vmatmul.msk.bf16.vlgmr.msra.gmra.mxu2 %vm512_vm5, %v1453_v49 }
 0x115   : > { %551 = vmatmul.bf16.gmra.mxu1 %v1174_v0 }
 0x116   : > { %1227 = vmatpush.bf16.msrb.mxu1 %v1487_v62 }
 0x117   : > { %637 = vmatpush.bf16.msra.mxu0 %v1487_v62 }
 0x118   : > { %1182 = vmatmul.msk.bf16.gmra.mxu0 %vm512_vm5, %v1485_v61 }
 0x119   : > { %665 = vmatmul.bf16.gmra.mxu3 %v1174_v0 }
 0x11a   : > { %1228 = vmatpush.bf16.msrb.mxu1 %v1532_v29 }
 0x11b   : > { %638 = vmatpush.bf16.msra.mxu0 %v1532_v29  ;;  %v1618_v29 = vpop.permute.xlu1 %464 }
 0x11e   : > { %1229 = vmatpush.bf16.msrb.mxu1 %v1371_v14 }
 0x11f   : > { %639 = vmatpush.bf16.msra.mxu0 %v1371_v14 }
 0x122   : > { %1230 = vmatpush.bf16.msrb.mxu1 %v1382_v17 }
 0x123   : > { %640 = vmatpush.bf16.msra.mxu0 %v1382_v17  ;;  %1184 = vmatmul.msk.bf16.gmra.mxu2 %vm512_vm5, %v1485_v61 }
 0x125   : > { %646 = vmatmul.bf16.vlgmr.msrb.gmra.mxu1 %v1525_v23  ;;  %v1603_v22 = vpop.f32.mrf.mxu2 }
 0x128   : > { %641 = vmatmul.bf16.vlgmr.msra.gmra.mxu0 %v1499_v2 }
 0x12d   : > { %v568_v25 = vpop.f32.mrf.mxu2 }
 0x135   : > { %v571_v49 = vpop.f32.mrf.mxu2 }
 0x13d   : > { %v573_v56 = vpop.f32.mrf.mxu2 }
 0x13e   : > { %v528_v31 = vpop.f32.mrf.mxu0 }
 0x13f   : > { %v529_v40 = vadd.f32 %v528_v31, %v1618_v29 }
 0x146   : > { %v530_v51 = vpop.f32.mrf.mxu0 }
 0x147   : > { %v531_v36 = vadd.f32 %v530_v51, %v1612_v24 }
 0x14e   : > { %v533_v14 = vpop.f32.mrf.mxu0 }
 0x14f   : > { %v534_v30 = vadd.f32 %v533_v14, %v1605_v15 }
 0x155   : > { %v1610_v23 = vpop.permute.xlu0 %479 }
 0x156   : > { %v535_v6 = vpop.f32.mrf.mxu0 }
 0x157   : > { %v536_v10 = vadd.f32 %v535_v6, %v1610_v23  ;;  %v1670_v6 = vld [vmem:[%s1825_s3 + $0x8] sm:$0xff] }
 0x16c   : > { %v585_v62 = vpop.f32.mrf.mxu3 }
 0x16d   : > { %v586_v33 = vadd.f32 %v585_v62, %v1618_v29 }
 0x174   : > { %v587_v3 = vpop.f32.mrf.mxu3 }
 0x175   : > { %v604_v5 = vpop.f32.mrf.mxu2  ;;  %v588_v27 = vadd.f32 %v587_v3, %v1612_v24 }
 0x176   : > { %v605_v48 = vadd.f32 %v604_v5, %v586_v33 }
 0x17c   : > { %v590_v17 = vpop.f32.mrf.mxu3 }
 0x17d   : > { %v606_v7 = vpop.f32.mrf.mxu2  ;;  %v591_v21 = vadd.f32 %v590_v17, %v1605_v15 }
 0x17e   : > { %v607_v39 = vadd.f32 %v606_v7, %v588_v27 }
 0x182   : > { %v547_v8 = vpop.f32.mrf.mxu1 }
 0x183   : > { %v548_v52 = vadd.f32 %v547_v8, %v529_v40  ;;  %v1678_v8 = vld [vmem:[%s1825_s3] sm:$0xff] }
 0x184   : > { %v592_v9 = vpop.f32.mrf.mxu3 }
 0x185   : > { %v623_v61 = vpop.f32.mrf.mxu0  ;;  %v593_v26 = vadd.f32 %v592_v9, %v1610_v23  ;;  %v567_v4 = vadd.f32 %v1603_v22, %v548_v52 }
 0x186   : > { %v609_v2 = vpop.f32.mrf.mxu2  ;;  %v624_v57 = vadd.f32 %v623_v61, %v605_v48 }
 0x187   : > { %v610_v35 = vadd.f32 %v609_v2, %v591_v21  ;;  %v1662_v3 = vmul.f32 %v692_v47, %v567_v4  ;;  %v694_v21 = vperm.slane %v1627_v34, 2 }
 0x188   : > { %v1650_v51 = vmul.f32 %v693_v43, %v624_v57 }
 0x189   : > { %v813_v27 = vmul.f32 %v1662_v3, %v1662_v3 }
 0x18a   : > { %v549_v12 = vpop.f32.mrf.mxu1  ;;  %v814_v7 = vmul.f32 %v1650_v51, %v1650_v51 }
 0x18b   : > { %v550_v44 = vadd.f32 %v549_v12, %v531_v36 }
 0x18c   : > { %v1607_v16 = vpop.f32.mrf.mxu3 }
 0x18d   : > { %v625_v13 = vpop.f32.mrf.mxu0  ;;  %v569_v60 = vadd.f32 %v568_v25, %v550_v44 }
 0x18e   : > { %v611_v18 = vpop.f32.mrf.mxu2  ;;  %v626_v50 = vadd.f32 %v625_v13, %v607_v39  ;;  %v713_v39 = vld [vmem:[%s1825_s3 + $0x18] sm:$0xff] }
 0x18f   : > { %v612_v37 = vadd.f32 %v611_v18, %v593_v26  ;;  %v1655_v14 = vmul.f32 %v692_v47, %v569_v60 }
 0x190   : > { %v1643_v1 = vmul.f32 %v693_v43, %v626_v50 }
 0x192   : > { %v552_v19 = vpop.f32.mrf.mxu1  ;;  %v817_v22 = vmul.f32 %v1643_v1, %v1643_v1 }
 0x193   : > { %v553_v38 = vadd.f32 %v552_v19, %v534_v30 }
 0x194   : > { %v1621_v32 = vpop.f32.mrf.mxu3 }
 0x195   : > { %v628_v20 = vpop.f32.mrf.mxu0  ;;  %v572_v53 = vadd.f32 %v571_v49, %v553_v38 }
 0x196   : > { %v1616_v28 = vpop.f32.mrf.mxu2  ;;  %v629_v11 = vadd.f32 %v628_v20, %v610_v35  ;;  %v816_v20 = vmul.f32 %v1655_v14, %v1655_v14 }
 0x197   : > { %v1646_v31 = vmul.f32 %v692_v47, %v572_v53 }
 0x198   : > { %v1636_v58 = vmul.f32 %v693_v43, %v629_v11 }
 0x199   : > { %v819_v12 = vmul.f32 %v1646_v31, %v1646_v31 }
 0x19a   : > { %v554_v41 = vpop.f32.mrf.mxu1  ;;  %v820_v62 = vmul.f32 %v1636_v58, %v1636_v58 }
 0x19b   : > { %v555_v45 = vadd.f32 %v554_v41, %v536_v10 }
 0x19c   : > { %v666_v49 = vpop.f32.mrf.mxu3 }
 0x19d   : > { %v630_v42 = vpop.f32.mrf.mxu0  ;;  %v574_v54 = vadd.f32 %v573_v56, %v555_v45 }
 0x19e   : > { %v631_v46 = vadd.f32 %v630_v42, %v612_v37  ;;  %v682_v59 = vpop.f32.mrf.mxu2 }
 0x19f   : > { %v1638_v63 = vmul.f32 %v692_v47, %v574_v54 }
 0x1a0   : > { %v1634_v55 = vmul.f32 %v693_v43, %v631_v46 }
 0x1a1   : > { %738 = vmatpush.msrb.mxu2 %v1638_v63  ;;  %1231 = vmatpush.msra.mxu3 %v1638_v63  ;;  %v822_v61 = vmul.f32 %v1638_v63, %v1638_v63 }
 0x1a2   : > { %v823_v0 = vmul.f32 %v1634_v55, %v1634_v55  ;;  %767 = vmatpush.msra.mxu1 %v1634_v55  ;;  %v647_v56 = vpop.f32.mrf.mxu1 }
 0x1a3   : > { %739 = vmatpush.msrb.mxu2 %v1646_v31  ;;  %1232 = vmatpush.msra.mxu3 %v1646_v31  ;;  %v648_v5 = vadd.f32 %v647_v56, %v1605_v15 }
 0x1a4   : > { %768 = vmatpush.msra.mxu1 %v1636_v58  ;;  %866 = vmatpush.msrb.mxu0 %v823_v0  ;;  %v668_v26 = vpop.f32.mrf.mxu3 }
 0x1a5   : > { %v642_v25 = vpop.f32.mrf.mxu0  ;;  %740 = vmatpush.msrb.mxu2 %v1655_v14  ;;  %1233 = vmatpush.msra.mxu3 %v1655_v14  ;;  %v667_v2 = vadd.f32 %v666_v49, %v648_v5 }
 0x1a6   : > { %769 = vmatpush.msra.mxu1 %v1643_v1  ;;  %867 = vmatpush.msrb.mxu0 %v820_v62  ;;  %v685_v17 = vpop.f32.mrf.mxu2  ;;  %v643_v9 = vadd.f32 %v642_v25, %v1618_v29 }
 0x1a7   : > { %741 = vmatpush.msrb.mxu2 %v1662_v3  ;;  %1234 = vmatpush.msra.mxu3 %v1662_v3  ;;  %v686_v30 = vadd.f32 %v685_v17, %v667_v2 }
 0x1a8   : > { %770 = vmatpush.msra.mxu1 %v1650_v51  ;;  %868 = vmatpush.msrb.mxu0 %v817_v22  ;;  %v662_v29 = vadd.f32 %v1607_v16, %v643_v9 }
 0x1a9   : > { %1186 = vmatmul.msk.f32.vlgmr.msra.gmra.mxu3 %vm512_vm5, %v1670_v6  ;;  %837 = vmatpush.msra.mxu2 %v822_v61  ;;  %v1709_v38 = vmul.f32 %v694_v21, %v686_v30 }
 0x1aa   : > { %869 = vmatpush.msrb.mxu0 %v814_v7  ;;  %1189 = vmatmul.msk.f32.vlgmr.msra.gmra.mxu1 %vm512_vm5, %v1678_v8  ;;  %v649_v15 = vpop.f32.mrf.mxu1  ;;  %v681_v34 = vadd.f32 %v1616_v28, %v662_v29 }
 0x1ab   : > { %1185 = vmatmul.msk.f32.vlgmr.msrb.gmra.mxu2 %vm512_vm5, %v1678_v8  ;;  %1201 = vmatmul.msk.f32.vlgmr.msrb.gmra.mxu0 %vm512_vm5, %v1678_v8  ;;  %v650_v19 = vadd.f32 %v649_v15, %v1610_v23  ;;  %v712_v23 = vld [vmem:[%s1825_s3 + $0x10] sm:$0xff]  ;;  %v821_v28 = vmul.f32 %v1709_v38, %v1709_v38 }
 0x1ac   : > { %838 = vmatpush.msra.mxu2 %v819_v12  ;;  %v1730_v40 = vmul.f32 %v694_v21, %v681_v34 }
 0x1ad   : > { %v644_v13 = vpop.f32.mrf.mxu0  ;;  %v669_v35 = vadd.f32 %v668_v26, %v650_v19 }
 0x1ae   : > { %v645_v18 = vadd.f32 %v644_v13, %v1612_v24  ;;  %839 = vmatpush.msra.mxu2 %v816_v20  ;;  %v687_v24 = vpop.f32.mrf.mxu2  ;;  %v815_v41 = vmul.f32 %v1730_v40, %v1730_v40 }
 0x1af   : > { %v688_v37 = vadd.f32 %v687_v24, %v669_v35 }
 0x1b0   : > { %v664_v33 = vadd.f32 %v1621_v32, %v645_v18  ;;  %840 = vmatpush.msra.mxu2 %v813_v27 }
 0x1b1   : > { %1187 = vmatmul.msk.f32.gmra.mxu3 %vm512_vm5, %v712_v23  ;;  %v1711_v16 = vmul.f32 %v694_v21, %v688_v37 }
 0x1b2   : > { %v683_v36 = vadd.f32 %v682_v59, %v664_v33  ;;  %1190 = vmatmul.msk.f32.gmra.mxu1 %vm512_vm5, %v1670_v6 }
 0x1b3   : > { %1197 = vmatmul.msk.f32.vlgmr.msra.gmra.mxu2 %vm512_vm5, %v1678_v8  ;;  %1202 = vmatmul.msk.f32.gmra.mxu0 %vm512_vm5, %v1670_v6  ;;  %v824_v32 = vmul.f32 %v1711_v16, %v1711_v16 }
 0x1b4   : > { %796 = vmatpush.msrb.mxu3 %v1711_v16  ;;  %v1722_v10 = vmul.f32 %v694_v21, %v683_v36 }
 0x1b5   : > { %895 = vmatpush.msrb.mxu1 %v824_v32 }
 0x1b6   : > { %797 = vmatpush.msrb.mxu3 %v1709_v38  ;;  %v818_v11 = vmul.f32 %v1722_v10, %v1722_v10 }
 0x1b7   : > { %896 = vmatpush.msrb.mxu1 %v821_v28 }
 0x1b8   : > { %798 = vmatpush.msrb.mxu3 %v1722_v10 }
 0x1b9   : > { %1188 = vmatmul.msk.f32.gmra.mxu3 %vm512_vm5, %v713_v39  ;;  %897 = vmatpush.msrb.mxu1 %v818_v11 }
 0x1ba   : > { %799 = vmatpush.msrb.mxu3 %v1730_v40  ;;  %1191 = vmatmul.msk.f32.gmra.mxu1 %vm512_vm5, %v712_v23 }
 0x1bb   : > { %1198 = vmatmul.msk.f32.gmra.mxu2 %vm512_vm5, %v1670_v6  ;;  %898 = vmatpush.msrb.mxu1 %v815_v41 }
 0x1bc   : > { %1203 = vmatmul.msk.f32.gmra.mxu0 %vm512_vm5, %v712_v23 }
 0x1c1   : > { %1193 = vmatmul.msk.f32.vlgmr.msrb.gmra.mxu3 %vm512_vm5, %v1678_v8 }
 0x1c2   : > { %1192 = vmatmul.msk.f32.gmra.mxu1 %vm512_vm5, %v713_v39 }
 0x1c3   : > { %1199 = vmatmul.msk.f32.gmra.mxu2 %vm512_vm5, %v712_v23 }
 0x1c4   : > { %1204 = vmatmul.msk.f32.gmra.mxu0 %vm512_vm5, %v713_v39 }
 0x1c9   : > { %1194 = vmatmul.msk.f32.gmra.mxu3 %vm512_vm5, %v1670_v6 }
 0x1ca   : > { %1205 = vmatmul.msk.f32.vlgmr.msrb.gmra.mxu1 %vm512_vm5, %v1678_v8 }
 0x1cb   : > { %1200 = vmatmul.msk.f32.gmra.mxu2 %vm512_vm5, %v713_v39 }
 0x1d1   : > { %1195 = vmatmul.msk.f32.gmra.mxu3 %vm512_vm5, %v712_v23 }
 0x1d2   : > { %1206 = vmatmul.msk.f32.gmra.mxu1 %vm512_vm5, %v1670_v6 }
 0x1d9   : > { %1196 = vmatmul.msk.f32.gmra.mxu3 %vm512_vm5, %v713_v39 }
 0x1da   : > { %1207 = vmatmul.msk.f32.gmra.mxu1 %vm512_vm5, %v712_v23 }
 0x1e2   : > { %1208 = vmatmul.msk.f32.gmra.mxu1 %vm512_vm5, %v713_v39 }
 0x227   : > { %v772_v42 = vpop.f32.mrf.mxu1 }
 0x228   : > { %v871_v52 = vpop.f32.mrf.mxu0 }
 0x22c   : > { %v746_v43 = vpop.f32.mrf.mxu3 }
 0x22e   : > { %v743_v46 = vpop.f32.mrf.mxu2 }
 0x22f   : > { %v775_v44 = vpop.f32.mrf.mxu1  ;;  %v912_v54 = vadd.f32 %v772_v42, %v743_v46 }
 0x230   : > { %v874_v56 = vpop.f32.mrf.mxu0  ;;  %v917_v62 = vadd.f32 %v775_v44, %v746_v43 }
 0x234   : > { %v749_v45 = vpop.f32.mrf.mxu3 }
 0x236   : > { %v842_v50 = vpop.f32.mrf.mxu2 }
 0x237   : > { %v778_v47 = vpop.f32.mrf.mxu1  ;;  %v936_v0 = vadd.f32 %v871_v52, %v842_v50 }
 0x238   : > { %v922_v12 = vadd.f32 %v778_v47, %v749_v45 }
 0x239   : > { %v877_v2 = vpop.f32.mrf.mxu0 }
 0x23c   : > { %v752_v48 = vpop.f32.mrf.mxu3 }
 0x23e   : > { %v845_v25 = vpop.f32.mrf.mxu2 }
 0x23f   : > { %v781_v53 = vpop.f32.mrf.mxu1  ;;  %v941_v7 = vadd.f32 %v874_v56, %v845_v25 }
 0x240   : > { %v927_v27 = vadd.f32 %v781_v53, %v752_v48 }
 0x241   : > { %v880_v23 = vpop.f32.mrf.mxu0 }
 0x244   : > { %v801_v57 = vpop.f32.mrf.mxu3 }
 0x245   : > { %v913_v59 = vsel %vm512_vm5, %v801_v57, 0.0 }
 0x246   : > { %v914_v60 = vadd.f32 %v913_v59, %v912_v54  ;;  %v848_v9 = vpop.f32.mrf.mxu2 }
 0x247   : > { %v900_v4 = vpop.f32.mrf.mxu1  ;;  %v946_v20 = vadd.f32 %v877_v2, %v848_v9 }
 0x248   : > { %915 = vadd.xlane.f32.xlu2 %v914_v60  ;;  %v937_v49 = vsel %vm512_vm5, %v900_v4, 0.0 }
 0x249   : > { %v938_v5 = vadd.f32 %v937_v49, %v936_v0 }
 0x24c   : > { %v804_v22 = vpop.f32.mrf.mxu3 }
 0x24d   : > { %v918_v6 = vsel %vm512_vm5, %v804_v22, 0.0 }
 0x24e   : > { %v919_v17 = vadd.f32 %v918_v6, %v917_v62  ;;  %v851_v35 = vpop.f32.mrf.mxu2 }
 0x24f   : > { %v903_v8 = vpop.f32.mrf.mxu1  ;;  %v951_v36 = vadd.f32 %v880_v23, %v851_v35 }
 0x250   : > { %920 = vadd.xlane.f32.xlu0 %v919_v17  ;;  %939 = vadd.xlane.f32.xlu2 %v938_v5  ;;  %v942_v61 = vsel %vm512_vm5, %v903_v8, 0.0 }
 0x251   : > { %v943_v15 = vadd.f32 %v942_v61, %v941_v7 }
 0x254   : > { %v807_v13 = vpop.f32.mrf.mxu3 }
 0x255   : > { %v923_v18 = vsel %vm512_vm5, %v807_v13, 0.0 }
 0x256   : > { %v924_v19 = vadd.f32 %v923_v18, %v922_v12 }
 0x257   : > { %v906_v21 = vpop.f32.mrf.mxu1 }
 0x258   : > { %925 = vadd.xlane.f32.xlu1 %v924_v19  ;;  %944 = vadd.xlane.f32.xlu0 %v943_v15  ;;  %v947_v26 = vsel %vm512_vm5, %v906_v21, 0.0 }
 0x259   : > { %v948_v30 = vadd.f32 %v947_v26, %v946_v20 }
 0x25c   : > { %v810_v29 = vpop.f32.mrf.mxu3 }
 0x25d   : > { %v928_v33 = vsel %vm512_vm5, %v810_v29, 0.0 }
 0x25e   : > { %v929_v24 = vadd.f32 %v928_v33, %v927_v27 }
 0x25f   : > { %v909_v37 = vpop.f32.mrf.mxu1 }
 0x260   : > { %930 = vadd.xlane.f32.xlu2 %v929_v24  ;;  %949 = vadd.xlane.f32.xlu1 %v948_v30  ;;  %v952_v34 = vsel %vm512_vm5, %v909_v37, 0.0 }
 0x261   : > { %v953_v32 = vadd.f32 %v952_v34, %v951_v36 }
 0x268   : > { %954 = vadd.xlane.f32.xlu2 %v953_v32 }
 0x2bb   : > { %v916_v28 = vpop.xlane.xlu2 %915 }
 0x2bc   : > { %v932_v39 = vmul.f32 0.0009765625, %v916_v28 }
 0x2be   : > { %v960_v42 = vmul.f32 %v932_v39, %v932_v39  ;;  %v1016_v9 = vsub.f32 %v1662_v3, %v932_v39  ;;  %v1017_v12 = vsub.f32 %v1650_v51, %v932_v39  ;;  %v1018_v19 = vsub.f32 %v1730_v40, %v932_v39 }
 0x2c3   : > { %v921_v11 = vpop.xlane.xlu0 %920  ;;  %v940_v41 = vpop.xlane.xlu2 %939 }
 0x2c4   : > { %v956_v43 = vmul.f32 0.0009765625, %v940_v41  ;;  %v1767_v45 = vmul.f32 0.0009765625, %v921_v11 }
 0x2c6   : > { %v964_v44 = vsub.f32 %v956_v43, %v960_v42  ;;  %v961_v52 = vmul.f32 %v1767_v45, %v1767_v45  ;;  %v1019_v41 = vsub.f32 %v1655_v14, %v1767_v45  ;;  %v1020_v42 = vsub.f32 %v1643_v1, %v1767_v45 }
 0x2c7   : > { %v1021_v43 = vsub.f32 %v1722_v10, %v1767_v45 }
 0x2c8   : > { %v968_v46 = vmax.f32 %v964_v44, 0.0 }
 0x2ca   : > { %v972_v47 = vadd.f32 1e-05, %v968_v46 }
 0x2cb   : > { %v926_v48 = vpop.xlane.xlu1 %925  ;;  %v945_v50 = vpop.xlane.xlu0 %944 }
 0x2cc   : > { %1256 = vrsqrt.f32 %v972_v47  ;;  %v957_v53 = vmul.f32 0.0009765625, %v945_v50  ;;  %v1771_v57 = vmul.f32 0.0009765625, %v926_v48  ;;  %vm982_vm10 = vweird.f32 %v972_v47 }
 0x2ce   : > { %v965_v54 = vsub.f32 %v957_v53, %v961_v52  ;;  %v962_v56 = vmul.f32 %v1771_v57, %v1771_v57 }
 0x2d0   : > { %v969_v59 = vmax.f32 %v965_v54, 0.0 }
 0x2d2   : > { %v1257_v60 = vpop.eup %1256  ;;  %v973_v0 = vadd.f32 1e-05, %v969_v59 }
 0x2d3   : > { %v977_v4 = vmul.f32 %v1257_v60, %v972_v47  ;;  %v931_v49 = vpop.xlane.xlu2 %930  ;;  %v950_v25 = vpop.xlane.xlu1 %949  ;;  %vm983_vm9 = vweird.f32 %v1257_v60 }
 0x2d4   : > { %1258 = vrsqrt.f32 %v973_v0  ;;  %v958_v62 = vmul.f32 0.0009765625, %v950_v25  ;;  %v1775_v17 = vmul.f32 0.0009765625, %v931_v49  ;;  %vm984_vm11 = vmor %vm982_vm10, %vm983_vm9  ;;  %vm992_vm14 = vweird.f32 %v973_v0 }
 0x2d5   : > { %v978_v22 = vmul.f32 %v1257_v60, %v977_v4  ;;  %v1022_v4 = vsub.f32 %v1646_v31, %v1771_v57  ;;  %v1023_v49 = vsub.f32 %v1636_v58, %v1771_v57  ;;  %v1024_v25 = vsub.f32 %v1709_v38, %v1771_v57 }
 0x2d6   : > { %v966_v5 = vsub.f32 %v958_v62, %v962_v56  ;;  %v963_v20 = vmul.f32 %v1775_v17, %v1775_v17  ;;  %v1025_v57 = vsub.f32 %v1638_v63, %v1775_v17 }
 0x2d7   : > { %v979_v6 = vmul.f32 0.5, %v978_v22 }
 0x2d8   : > { %v970_v7 = vmax.f32 %v966_v5, 0.0 }
 0x2d9   : > { %v980_v8 = vsub.f32 1.5, %v979_v6 }
 0x2da   : > { %v1259_v61 = vpop.eup %1258  ;;  %v974_v2 = vadd.f32 1e-05, %v970_v7 }
 0x2db   : > { %v981_v13 = vmul.f32 %v1257_v60, %v980_v8  ;;  %v987_v15 = vmul.f32 %v1259_v61, %v973_v0  ;;  %v955_v18 = vpop.xlane.xlu2 %954  ;;  %vm993_vm12 = vweird.f32 %v1259_v61 }
 0x2dc   : > { %1260 = vrsqrt.f32 %v974_v2  ;;  %v959_v21 = vmul.f32 0.0009765625, %v955_v18  ;;  %vm994_vm15 = vmor %vm992_vm14, %vm993_vm12  ;;  %vm1002_vm1 = vweird.f32 %v974_v2 }
 0x2dd   : > { %v985_v26 = vsel %vm984_vm11, %v1257_v60, %v981_v13  ;;  %v988_v27 = vmul.f32 %v1259_v61, %v987_v15  ;;  %v1027_v13 = vsub.f32 %v1711_v16, %v1775_v17 }
 0x2de   : > { %v1028_v29 = vmul.f32 %v1016_v9, %v985_v26  ;;  %v1029_v3 = vmul.f32 %v1017_v12, %v985_v26  ;;  %v1030_v30 = vmul.f32 %v1018_v19, %v985_v26  ;;  %v967_v33 = vsub.f32 %v959_v21, %v963_v20 }
 0x2df   : > { %v989_v51 = vmul.f32 0.5, %v988_v27  ;;  %v1026_v12 = vsub.f32 %v1634_v55, %v1775_v17 }
 0x2e0   : > { %v1040_v35 = vmax.f32 %v1028_v29, 0.0  ;;  %v1041_v23 = vmax.f32 %v1029_v3, 0.0  ;;  %v1042_v24 = vmax.f32 %v1030_v30, 0.0  ;;  %v971_v36 = vmax.f32 %v967_v33, 0.0 }
 0x2e1   : > { %v990_v40 = vsub.f32 1.5, %v989_v51 }
 0x2e2   : > { %v1261_v37 = vpop.eup %1260  ;;  %v1052_v34 = vpack.c.bf16 %v1041_v23, %v1040_v35  ;;  %v1053_v32 = vpack.c.bf16 %v1042_v24, %v1042_v24  ;;  %v975_v28 = vadd.f32 1e-05, %v971_v36 }
 0x2e3   : > { %v991_v39 = vmul.f32 %v1259_v61, %v990_v40  ;;  %v997_v11 = vmul.f32 %v1261_v37, %v974_v2  ;;  %vm1003_vm0 = vweird.f32 %v1261_v37 }
 0x2e4   : > { %1060 = vst [vmem:[%s1787_s7] sm:$0xff] %v1052_v34  ;;  %1262 = vrsqrt.f32 %v975_v28  ;;  %vm1004_vm2 = vmor %vm1002_vm1, %vm1003_vm0  ;;  %vm1012_vm4 = vweird.f32 %v975_v28 }
 0x2e5   : > { %1062 = vst.msk [vmem:[%s1787_s7 + $0x8] sm:$0xf] %vm1061_vm13, %v1053_v32  ;;  %v995_v44 = vsel %vm994_vm15, %v1259_v61, %v991_v39  ;;  %v998_v46 = vmul.f32 %v1261_v37, %v997_v11 }
 0x2e6   : > { %v1031_v47 = vmul.f32 %v1019_v41, %v995_v44  ;;  %v1032_v48 = vmul.f32 %v1020_v42, %v995_v44  ;;  %v1033_v50 = vmul.f32 %v1021_v43, %v995_v44 }
 0x2e7   : > { %v999_v52 = vmul.f32 0.5, %v998_v46 }
 0x2e8   : > { %v1043_v53 = vmax.f32 %v1031_v47, 0.0  ;;  %v1044_v14 = vmax.f32 %v1032_v48, 0.0  ;;  %v1045_v54 = vmax.f32 %v1033_v50, 0.0 }
 0x2e9   : > { %v1000_v1 = vsub.f32 1.5, %v999_v52 }
 0x2ea   : > { %v1263_v59 = vpop.eup %1262  ;;  %v1054_v10 = vpack.c.bf16 %v1044_v14, %v1043_v53  ;;  %v1055_v45 = vpack.c.bf16 %v1045_v54, %v1045_v54 }
 0x2eb   : > { %v1001_v60 = vmul.f32 %v1261_v37, %v1000_v1  ;;  %v1007_v0 = vmul.f32 %v1263_v59, %v975_v28  ;;  %vm1013_vm3 = vweird.f32 %v1263_v59 }
 0x2ec   : > { %1063 = vst [vmem:[%s1787_s7 + $0xc] sm:$0xff] %v1054_v10  ;;  %vm1014_vm5 = vmor %vm1012_vm4, %vm1013_vm3 }
 0x2ed   : > { %1064 = vst.msk [vmem:[%s1787_s7 + $0x14] sm:$0xf] %vm1061_vm13, %v1055_v45  ;;  %v1005_v56 = vsel %vm1004_vm2, %v1261_v37, %v1001_v60  ;;  %v1008_v62 = vmul.f32 %v1263_v59, %v1007_v0 }
 0x2ee   : > { %v1034_v22 = vmul.f32 %v1022_v4, %v1005_v56  ;;  %v1035_v5 = vmul.f32 %v1023_v49, %v1005_v56  ;;  %v1036_v6 = vmul.f32 %v1024_v25, %v1005_v56 }
 0x2ef   : > { %v1009_v7 = vmul.f32 0.5, %v1008_v62 }
 0x2f0   : > { %v1046_v8 = vmax.f32 %v1034_v22, 0.0  ;;  %v1047_v31 = vmax.f32 %v1035_v5, 0.0  ;;  %v1048_v61 = vmax.f32 %v1036_v6, 0.0 }
 0x2f1   : > { %v1010_v9 = vsub.f32 1.5, %v1009_v7 }
 0x2f2   : > { %v1056_v58 = vpack.c.bf16 %v1047_v31, %v1046_v8  ;;  %v1057_v2 = vpack.c.bf16 %v1048_v61, %v1048_v61 }
 0x2f3   : > { %v1011_v38 = vmul.f32 %v1263_v59, %v1010_v9 }
 0x2f4   : > { %1065 = vst [vmem:[%s1787_s7 + $0x18] sm:$0xff] %v1056_v58 }
 0x2f5   : > { %1066 = vst.msk [vmem:[%s1787_s7 + $0x20] sm:$0xf] %vm1061_vm13, %v1057_v2  ;;  %v1015_v15 = vsel %vm1014_vm5, %v1263_v59, %v1011_v38 }
 0x2f6   : > { %v1037_v18 = vmul.f32 %v1025_v57, %v1015_v15  ;;  %v1038_v19 = vmul.f32 %v1026_v12, %v1015_v15  ;;  %v1039_v20 = vmul.f32 %v1027_v13, %v1015_v15 }
 0x2f8   : > { %v1049_v21 = vmax.f32 %v1037_v18, 0.0  ;;  %v1050_v26 = vmax.f32 %v1038_v19, 0.0  ;;  %v1051_v27 = vmax.f32 %v1039_v20, 0.0 }
 0x2fa   : > { %v1058_v29 = vpack.c.bf16 %v1050_v26, %v1049_v21  ;;  %v1059_v63 = vpack.c.bf16 %v1051_v27, %v1051_v27 }
 0x2fc   : > { %1067 = vst [vmem:[%s1787_s7 + $0x24] sm:$0xff] %v1058_v29 }
 0x2fd   : > { %1068 = vst.msk [vmem:[%s1787_s7 + $0x2c] sm:$0xf] %vm1061_vm13, %v1059_v63 }
 0x2fe PF: > { %s15_s18 = sadd.s32 1, %s1270_s18  }
 0x2ff   : > { %p12_p4 = scmp.ge.s32.totalorder %s15_s18, 4  }
 0x301   :  { %14 = sbr.rel (!%p12_p4) target bundleno = 1 (0x1), region = 70 }

// kernel: decoder_block_forward.3
= control target key start
LH: loop header
LB: loop body
LE: loop exit
PB: predicated region body
PF: predicated region fallthrough
CT: control target
= control target key end

     0   :  { %s1426_s18 = smov 0   ;;  %s1934_s0 = inlined_call_operand.vmem [shape: bf16[2,8,1158], index: 0, kind: input, shape index: {}]   ;;  %s1935_s1 = inlined_call_operand.vmem [shape: bf16[8,72], index: 1, kind: input, shape index: {}]   ;;  %s1936_s2 = inlined_call_operand.vmem [shape: f32[8,1], index: 2, kind: input, shape index: {}]   ;;  %s1937_s3 = inlined_call_operand.vmem [shape: f32[8,8], index: 3, kind: input, shape index: {}]   ;;  %s1938_s4 = inlined_call_operand.vmem [shape: f32[1,1088], index: 4, kind: input, shape index: {}]   ;;  %s1939_s5 = inlined_call_operand.vmem [shape: f32[2,8,1088], index: 5, kind: output, shape index: {}]  }
   0x1 LB: > { %s1320_s19 = sadd.s32 4294967295, %s1385_s18   ;;  %p1324_p0 = scmp.ge.s32.totalorder %s1385_s18, 1  ;;  %s1385_s18 = sphi %s1426_s18, %s15_s18  }
   0x2   : > { %p187_p1 = scmp.lt.s32.totalorder %s1385_s18, 3 }
   0x4   : > { %p188_p2 = pnand %p1324_p0, %p187_p1 }
   0x5   : > { %p215_p3 = scmp.lt.s32.totalorder (!%p188_p2), %s1320_s19, 1  ;;  %s1387_s24 = smov (!%p188_p2), 59  }
   0x6   : > { %191 = sbr.rel (%p188_p2) target bundleno = 779 (0x30b), region = 40  ;;  %s1388_s25 = smov (!%p188_p2), 60  }
   0x7   : > { %s1389_s26 = smov (!%p188_p2), 58   ;;  %s1390_s27 = smov (!%p188_p2), 92  }
   0x8   : > { %s1391_s28 = smov (!%p188_p2), 93   ;;  %s1392_s29 = smov (!%p188_p2), 126  }
   0x9   : > { %s1393_s30 = smov (!%p188_p2), 94   ;;  %s1394_s6 = smov (!%p188_p2), 127  }
   0xb   : > { %s1941_s19 = smov (!%p215_p3, %s1320_s19), 1  ;;  %vm475_vm0 = vcmask 474112   ;;  %vm485_vm1 = vcmask 1043456   ;;  %vm415_vm2 = vcmask 490496   ;;  %vm445_vm3 = vcmask 482304  }
   0xc   : > { %s1356_s20 = smul.u32 40, %s1941_s19  ;;  %vm354_vm4 = vcmask 760832   ;;  %vm381_vm5 = vcmask 752640   ;;  %vm300_vm6 = vcmask 1031168   ;;  %vm327_vm7 = vcmask 769024  }
   0xd   : > { %vm273_vm8 = vcmask 1039360   ;;  %vm637_vm9 = vcmask 588800   ;;  %vm817_vm10 = vcmask 64512   ;;  %vm1197_vm11 = vcmask 523264   ;;  %s1357_s17 = smul.u32 72, %s1941_s19 }
   0xe   : > { %s1440_s23 = scalar_lea.vmem %s1934_s0, %s1356_s20 }
   0xf   : > { %v226_v0 = vld [vmem:[%s1440_s23] sm:$0xff]  ;;  %v227_v5 = vld [vmem:[%s1440_s23 + $0x8] sm:$0xff]  ;;  %v228_v10 = vld [vmem:[%s1440_s23 + $0x10] sm:$0xff]  ;;  %s224_s21 = scalar_lea.vmem %s1939_s5, %s1357_s17 }
  0x10   : > { %v237_v1 = vunpack.c.l.b16 %v226_v0  ;;  %v238_v3 = vunpack.c.h.b16 %v226_v0  ;;  %v240_v6 = vunpack.c.h.b16 %v227_v5  ;;  %v239_v7 = vunpack.c.l.b16 %v227_v5  ;;  %v1542_v18 = vld [vmem:[%s1440_s23 + $0x20] sm:$0xff]  ;;  %v229_v19 = vld [vmem:[%s1440_s23 + $0x18] sm:$0xff] }
  0x11   : > { %v241_v11 = vunpack.c.l.b16 %v228_v10  ;;  %v242_v13 = vunpack.c.h.b16 %v228_v10  ;;  %v391_v20 = vunpack.c.l.b16 %v1542_v18  ;;  %v244_v21 = vunpack.c.h.b16 %v229_v19  ;;  %v230_v51 = vld [vmem:[%s1440_s23 + $0x20] sm:$0xf] }
  0x12   : > { %v1443_v2 = vpack.c.b16 %v237_v1, %v237_v1  ;;  %v1451_v4 = vpack.c.b16 %v238_v3, %v238_v3  ;;  %v1466_v8 = vpack.c.b16 %v240_v6, %v240_v6  ;;  %v1468_v9 = vpack.c.b16 %v239_v7, %v239_v7 }
  0x13   : > { %v1477_v12 = vpack.c.b16 %v241_v11, %v241_v11  ;;  %v1515_v14 = vpack.c.b16 %v242_v13, %v242_v13  ;;  %v243_v22 = vunpack.c.l.b16 %v229_v19  ;;  %v393_v26 = vpack.c.b16 %v391_v20, %v391_v20 }
  0x14   : > { %425 = vrot.lane.b32.xlu2 %v1443_v2, %s1387_s24  ;;  %395 = vrot.lane.b32.xlu1 %v1443_v2, %s1388_s25  ;;  %v1552_v27 = vpack.c.b16 %v244_v21, %v244_v21  ;;  %v245_v54 = vunpack.c.l.b16 %v230_v51  ;;  %v392_v5 = vunpack.c.h.b16 %v1542_v18 }
  0x15   : > { %455 = vrot.lane.b32.xlu0 %v1443_v2, %s1389_s26  ;;  %v1554_v28 = vpack.c.b16 %v243_v22, %v243_v22 }
  0x16   : > { %v1608_v59 = vpack.c.b16 %v245_v54, %v245_v54  ;;  %v394_v11 = vpack.c.b16 %v392_v5, %v392_v5 }
  0x1c   : > { %427 = vrot.lane.b32.xlu2 %v1451_v4, %s1387_s24  ;;  %397 = vrot.lane.b32.xlu1 %v1451_v4, %s1388_s25 }
  0x1d   : > { %457 = vrot.lane.b32.xlu0 %v1451_v4, %s1389_s26 }
  0x24   : > { %363 = vrot.lane.b32.xlu2 %v1443_v2, %s1390_s27  ;;  %338 = vrot.lane.b32.xlu1 %v1451_v4, %s1391_s28 }
  0x25   : > { %336 = vrot.lane.b32.xlu0 %v1443_v2, %s1391_s28 }
  0x2c   : > { %461 = vrot.lane.b32.xlu2 %v1466_v8, %s1389_s26  ;;  %459 = vrot.lane.b32.xlu1 %v1468_v9, %s1389_s26 }
  0x2d   : > { %365 = vrot.lane.b32.xlu0 %v1451_v4, %s1390_s27 }
  0x34   : > { %284 = vrot.lane.b32.xlu2 %v1451_v4, %s1392_s29  ;;  %282 = vrot.lane.b32.xlu1 %v1443_v2, %s1392_s29 }
  0x35   : > { %463 = vrot.lane.b32.xlu0 %v1477_v12, %s1389_s26 }
  0x3c   : > { %399 = vrot.lane.b32.xlu2 %v1468_v9, %s1388_s25  ;;  %311 = vrot.lane.b32.xlu1 %v1451_v4, %s1393_s30 }
  0x3d   : > { %309 = vrot.lane.b32.xlu0 %v1443_v2, %s1393_s30 }
  0x44   : > { %429 = vrot.lane.b32.xlu2 %v1468_v9, %s1387_s24  ;;  %403 = vrot.lane.b32.xlu1 %v1477_v12, %s1388_s25 }
  0x45   : > { %401 = vrot.lane.b32.xlu0 %v1466_v8, %s1388_s25 }
  0x4c   : > { %255 = vrot.lane.b32.xlu2 %v1443_v2, %s1394_s6  ;;  %433 = vrot.lane.b32.xlu1 %v1477_v12, %s1387_s24 }
  0x4d   : > { %431 = vrot.lane.b32.xlu0 %v1466_v8, %s1387_s24 }
  0x54   : > { %342 = vrot.lane.b32.xlu2 %v1466_v8, %s1391_s28  ;;  %340 = vrot.lane.b32.xlu1 %v1468_v9, %s1391_s28 }
  0x55   : > { %257 = vrot.lane.b32.xlu0 %v1451_v4, %s1394_s6 }
  0x5c   : > { %369 = vrot.lane.b32.xlu2 %v1466_v8, %s1390_s27  ;;  %367 = vrot.lane.b32.xlu1 %v1468_v9, %s1390_s27 }
  0x5d   : > { %344 = vrot.lane.b32.xlu0 %v1477_v12, %s1391_s28 }
  0x64   : > { %286 = vrot.lane.b32.xlu2 %v1468_v9, %s1392_s29  ;;  %465 = vrot.lane.b32.xlu1 %v1515_v14, %s1389_s26 }
  0x65   : > { %371 = vrot.lane.b32.xlu0 %v1477_v12, %s1390_s27 }
  0x6c   : > { %313 = vrot.lane.b32.xlu2 %v1468_v9, %s1393_s30  ;;  %290 = vrot.lane.b32.xlu1 %v1477_v12, %s1392_s29 }
  0x6d   : > { %288 = vrot.lane.b32.xlu0 %v1466_v8, %s1392_s29 }
  0x6e   : > { %v426_v15 = vpop.permute.xlu2 %425 }
  0x74   : > { %405 = vrot.lane.b32.xlu2 %v1515_v14, %s1388_s25  ;;  %317 = vrot.lane.b32.xlu1 %v1477_v12, %s1393_s30 }
  0x75   : > { %315 = vrot.lane.b32.xlu0 %v1466_v8, %s1393_s30 }
  0x76   : > { %v428_v16 = vpop.permute.xlu2 %427 }
  0x77   : > { %v446_v35 = vsel %vm445_vm3, %v426_v15, %v428_v16 }
  0x7c   : > { %261 = vrot.lane.b32.xlu2 %v1466_v8, %s1394_s6  ;;  %259 = vrot.lane.b32.xlu1 %v1468_v9, %s1394_s6 }
  0x7d   : > { %435 = vrot.lane.b32.xlu0 %v1515_v14, %s1387_s24 }
  0x7e   : > { %v364_v17 = vpop.permute.xlu2 %363 }
  0x84   : > { %373 = vrot.lane.b32.xlu2 %v1515_v14, %s1390_s27  ;;  %346 = vrot.lane.b32.xlu1 %v1515_v14, %s1391_s28 }
  0x85   : > { %263 = vrot.lane.b32.xlu0 %v1477_v12, %s1394_s6 }
  0x86   : > { %v462_v23 = vpop.permute.xlu2 %461  ;;  %v396_v24 = vpop.permute.xlu1 %395 }
  0x87   : > { %v456_v25 = vpop.permute.xlu0 %455 }
  0x8c   : > { %471 = vrot.lane.b32.xlu2 %v393_v26, %s1389_s26  ;;  %469 = vrot.lane.b32.xlu1 %v1552_v27, %s1389_s26 }
  0x8d   : > { %467 = vrot.lane.b32.xlu0 %v1554_v28, %s1389_s26 }
  0x8e   : > { %v1561_v29 = vpop.permute.xlu2 %284  ;;  %v398_v30 = vpop.permute.xlu1 %397 }
  0x8f   : > { %v458_v31 = vpop.permute.xlu0 %457  ;;  %v416_v34 = vsel %vm415_vm2, %v396_v24, %v398_v30 }
  0x90   : > { %v476_v32 = vsel %vm475_vm0, %v456_v25, %v458_v31  ;;  %v596_v36 = vsel %vm485_vm1, %v416_v34, %v446_v35 }
  0x91   : > { %v642_v33 = vsel %vm485_vm1, %v476_v32, 0 }
  0x92   : > { %671 = vmatpush.bf16.msra.mxu0 %v642_v33 }
  0x94   : > { %407 = vrot.lane.b32.xlu2 %v1554_v28, %s1388_s25  ;;  %319 = vrot.lane.b32.xlu1 %v1515_v14, %s1393_s30 }
  0x95   : > { %292 = vrot.lane.b32.xlu0 %v1515_v14, %s1392_s29 }
  0x96   : > { %672 = vmatpush.bf16.msra.mxu0 %v596_v36  ;;  %v1574_v37 = vpop.permute.xlu2 %399  ;;  %v1576_v38 = vpop.permute.xlu1 %338 }
  0x97   : > { %v337_v39 = vpop.permute.xlu0 %336  ;;  %v417_v52 = vsel %vm415_vm2, %v398_v30, %v1574_v37 }
  0x98   : > { %v355_v45 = vsel %vm354_vm4, %v337_v39, %v1576_v38 }
  0x9c   : > { %437 = vrot.lane.b32.xlu2 %v1554_v28, %s1387_s24  ;;  %411 = vrot.lane.b32.xlu1 %v393_v26, %s1388_s25 }
  0x9d   : > { %409 = vrot.lane.b32.xlu0 %v1552_v27, %s1388_s25 }
  0x9e   : > { %v430_v40 = vpop.permute.xlu2 %429  ;;  %v460_v41 = vpop.permute.xlu1 %459 }
  0x9f   : > { %v1583_v42 = vpop.permute.xlu0 %365  ;;  %v477_v43 = vsel %vm475_vm0, %v458_v31, %v460_v41  ;;  %v478_v44 = vsel %vm475_vm0, %v460_v41, %v462_v23  ;;  %v447_v49 = vsel %vm445_vm3, %v428_v16, %v430_v40 }
  0xa0   : > { %v382_v46 = vsel %vm381_vm5, %v364_v17, %v1583_v42  ;;  %v645_v47 = vsel %vm485_vm1, %v477_v43, 0  ;;  %v648_v48 = vsel %vm485_vm1, %v478_v44, 0  ;;  %v600_v53 = vsel %vm485_vm1, %v417_v52, %v447_v49 }
  0xa1   : > { %v560_v50 = vsel %vm485_vm1, %v355_v45, %v382_v46  ;;  %684 = vmatpush.bf16.msra.mxu1 %v645_v47  ;;  %697 = vmatpush.bf16.msra.mxu2 %v648_v48 }
  0xa2   : > { %673 = vmatpush.bf16.msra.mxu0 %v560_v50 }
  0xa4   : > { %265 = vrot.lane.b32.xlu2 %v1515_v14, %s1394_s6  ;;  %441 = vrot.lane.b32.xlu1 %v393_v26, %s1387_s24 }
  0xa5   : > { %439 = vrot.lane.b32.xlu0 %v1552_v27, %s1387_s24  ;;  %685 = vmatpush.bf16.msra.mxu1 %v600_v53 }
  0xa6   : > { %v256_v55 = vpop.permute.xlu2 %255  ;;  %v283_v56 = vpop.permute.xlu1 %282 }
  0xa7   : > { %v1604_v57 = vpop.permute.xlu0 %463  ;;  %v301_v0 = vsel %vm300_vm6, %v283_v56, %v1561_v29 }
  0xa8   : > { %v479_v58 = vsel %vm475_vm0, %v462_v23, %v1604_v57 }
  0xa9   : > { %v651_v60 = vsel %vm485_vm1, %v479_v58, 0 }
  0xaa   : > { %710 = vmatpush.bf16.msra.mxu3 %v651_v60 }
  0xac   : > { %352 = vrot.lane.b32.xlu2 %v1608_v59, %s1391_s28  ;;  %350 = vrot.lane.b32.xlu1 %v1552_v27, %s1391_s28 }
  0xad   : > { %348 = vrot.lane.b32.xlu0 %v1554_v28, %s1391_s28 }
  0xae   : > { %v1617_v61 = vpop.permute.xlu2 %342  ;;  %v312_v62 = vpop.permute.xlu1 %311 }
  0xaf   : > { %v310_v63 = vpop.permute.xlu0 %309 }
  0xb0   : > { %v328_v1 = vsel %vm327_vm7, %v310_v63, %v312_v62 }
  0xb1   : > { %v524_v3 = vsel %vm485_vm1, %v301_v0, %v328_v1 }
  0xb2   : > { %674 = vmatpush.bf16.msra.mxu0 %v524_v3 }
  0xb4   : > { %379 = vrot.lane.b32.xlu2 %v1608_v59, %s1390_s27  ;;  %377 = vrot.lane.b32.xlu1 %v1552_v27, %s1390_s27 }
  0xb5   : > { %375 = vrot.lane.b32.xlu0 %v1554_v28, %s1390_s27 }
  0xb6   : > { %v370_v6 = vpop.permute.xlu2 %369  ;;  %v1630_v7 = vpop.permute.xlu1 %403 }
  0xb7   : > { %v402_v10 = vpop.permute.xlu0 %401 }
  0xb8   : > { %v418_v17 = vsel %vm415_vm2, %v1574_v37, %v402_v10  ;;  %v419_v18 = vsel %vm415_vm2, %v402_v10, %v1630_v7 }
  0xbc   : > { %296 = vrot.lane.b32.xlu2 %v1552_v27, %s1392_s29  ;;  %294 = vrot.lane.b32.xlu1 %v1554_v28, %s1392_s29 }
  0xbd   : > { %473 = vrot.lane.b32.xlu0 %v394_v11, %s1389_s26 }
  0xbe   : > { %v287_v13 = vpop.permute.xlu2 %286  ;;  %v1637_v15 = vpop.permute.xlu1 %433 }
  0xbf   : > { %v432_v16 = vpop.permute.xlu0 %431 }
  0xc0   : > { %v448_v19 = vsel %vm445_vm3, %v430_v40, %v432_v16  ;;  %v449_v20 = vsel %vm445_vm3, %v432_v16, %v1637_v15 }
  0xc1   : > { %v604_v21 = vsel %vm485_vm1, %v418_v17, %v448_v19  ;;  %v608_v22 = vsel %vm485_vm1, %v419_v18, %v449_v20 }
  0xc2   : > { %698 = vmatpush.bf16.msra.mxu2 %v604_v21  ;;  %711 = vmatpush.bf16.msra.mxu3 %v608_v22 }
  0xc4   : > { %323 = vrot.lane.b32.xlu2 %v1552_v27, %s1393_s30  ;;  %321 = vrot.lane.b32.xlu1 %v1554_v28, %s1393_s30 }
  0xc5   : > { %298 = vrot.lane.b32.xlu0 %v1608_v59, %s1392_s29 }
  0xc6   : > { %v314_v23 = vpop.permute.xlu2 %313  ;;  %v341_v24 = vpop.permute.xlu1 %340 }
  0xc7   : > { %v258_v25 = vpop.permute.xlu0 %257  ;;  %v356_v33 = vsel %vm354_vm4, %v1576_v38, %v341_v24  ;;  %v357_v34 = vsel %vm354_vm4, %v341_v24, %v1617_v61  ;;  %v329_v40 = vsel %vm327_vm7, %v312_v62, %v314_v23  ;;  %v302_v38 = vsel %vm300_vm6, %v1561_v29, %v287_v13 }
  0xc8   : > { %v274_v26 = vsel %vm273_vm8, %v256_v55, %v258_v25  ;;  %v528_v41 = vsel %vm485_vm1, %v302_v38, %v329_v40 }
  0xc9   : > { %v488_v30 = vsel %vm485_vm1, %v1443_v2, %v274_v26 }
  0xca   : > { %675 = vmatpush.bf16.msra.mxu0 %v488_v30 }
  0xcc   : > { %443 = vrot.lane.b32.xlu2 %v394_v11, %s1387_s24  ;;  %413 = vrot.lane.b32.xlu1 %v394_v11, %s1388_s25 }
  0xcd   : > { %325 = vrot.lane.b32.xlu0 %v1608_v59, %s1393_s30 }
  0xce   : > { %v1661_v31 = vpop.permute.xlu2 %405  ;;  %v368_v32 = vpop.permute.xlu1 %367 }
  0xcf   : > { %v383_v2 = vsel %vm381_vm5, %v1583_v42, %v368_v32  ;;  %v384_v35 = vsel %vm381_vm5, %v368_v32, %v370_v6  ;;  %v345_v36 = vpop.permute.xlu0 %344  ;;  %v420_v3 = vsel %vm415_vm2, %v1630_v7, %v1661_v31 }
  0xd0   : > { %v564_v37 = vsel %vm485_vm1, %v356_v33, %v383_v2  ;;  %v568_v39 = vsel %vm485_vm1, %v357_v34, %v384_v35  ;;  %v358_v29 = vsel %vm354_vm4, %v1617_v61, %v345_v36 }
  0xd1   : > { %686 = vmatpush.bf16.msra.mxu1 %v564_v37  ;;  %699 = vmatpush.bf16.msra.mxu2 %v568_v39 }
  0xd4   : > { %269 = vrot.lane.b32.xlu1 %v1552_v27, %s1394_s6  ;;  %271 = vrot.lane.b32.xlu2 %v1608_v59, %s1394_s6 }
  0xd5   : > { %267 = vrot.lane.b32.xlu0 %v1554_v28, %s1394_s6  ;;  %687 = vmatpush.bf16.msra.mxu1 %v528_v41 }
  0xd6   : > { %v262_v42 = vpop.permute.xlu2 %261  ;;  %v466_v43 = vpop.permute.xlu1 %465 }
  0xd7   : > { %v372_v44 = vpop.permute.xlu0 %371  ;;  %v480_v45 = vsel %vm475_vm0, %v1604_v57, %v466_v43 }
  0xd8   : > { %v385_v46 = vsel %vm381_vm5, %v370_v6, %v372_v44  ;;  %v654_v47 = vsel %vm485_vm1, %v480_v45, 0 }
  0xd9   : > { %v572_v48 = vsel %vm485_vm1, %v358_v29, %v385_v46  ;;  %723 = vmatpush.bf16.msrb.mxu0 %v654_v47 }
  0xda   : > { %712 = vmatpush.bf16.msra.mxu3 %v572_v48 }
  0xde   : > { %v291_v49 = vpop.permute.xlu1 %290  ;;  %v1689_v50 = vpop.permute.xlu2 %373 }
  0xdf   : > { %v289_v51 = vpop.permute.xlu0 %288  ;;  %v386_v7 = vsel %vm381_vm5, %v372_v44, %v1689_v50 }
  0xe0   : > { %v303_v54 = vsel %vm300_vm6, %v287_v13, %v289_v51  ;;  %v304_v55 = vsel %vm300_vm6, %v289_v51, %v291_v49 }
  0xe6   : > { %v318_v52 = vpop.permute.xlu1 %317  ;;  %v1695_v58 = vpop.permute.xlu2 %471 }
  0xe7   : > { %v316_v53 = vpop.permute.xlu0 %315 }
  0xe8   : > { %v330_v56 = vsel %vm327_vm7, %v314_v23, %v316_v53  ;;  %v331_v57 = vsel %vm327_vm7, %v316_v53, %v318_v52 }
  0xe9   : > { %v532_v60 = vsel %vm485_vm1, %v303_v54, %v330_v56  ;;  %v536_v61 = vsel %vm485_vm1, %v304_v55, %v331_v57  ;;  %v631_v55 = vld [vmem:[%s1936_s2] sm:$0xff] }
  0xea   : > { %700 = vmatpush.bf16.msra.mxu2 %v532_v60  ;;  %713 = vmatpush.bf16.msra.mxu3 %v536_v61 }
  0xee   : > { %v260_v62 = vpop.permute.xlu1 %259  ;;  %v408_v13 = vpop.permute.xlu2 %407 }
  0xef   : > { %v275_v63 = vsel %vm273_vm8, %v258_v25, %v260_v62  ;;  %v276_v0 = vsel %vm273_vm8, %v260_v62, %v262_v42  ;;  %v436_v1 = vpop.permute.xlu0 %435  ;;  %v421_v32 = vsel %vm415_vm2, %v1661_v31, %v408_v13  ;;  %v1742_v31 = vld [vmem:[%s1935_s1] sm:$0xf] }
  0xf0   : > { %v450_v5 = vsel %vm445_vm3, %v1637_v15, %v436_v1  ;;  %v492_v6 = vsel %vm485_vm1, %v1451_v4, %v275_v63  ;;  %v496_v10 = vsel %vm485_vm1, %v1468_v9, %v276_v0  ;;  %1327 = vmatmul.msk.bf16.vlgmr.msra.gmra.mxu0 %vm637_vm9, %v1742_v31 }
  0xf1   : > { %688 = vmatpush.bf16.msra.mxu1 %v492_v6  ;;  %701 = vmatpush.bf16.msra.mxu2 %v496_v10  ;;  %v612_v11 = vsel %vm485_vm1, %v420_v3, %v450_v5 }
  0xf2   : > { %724 = vmatpush.bf16.msrb.mxu0 %v612_v11 }
  0xf4   : > { %1329 = vmatmul.msk.bf16.vlgmr.msra.gmra.mxu2 %vm637_vm9, %v1742_v31  ;;  %1328 = vmatmul.msk.bf16.vlgmr.msra.gmra.mxu1 %vm637_vm9, %v1742_v31 }
  0xf6   : > { %v1711_v16 = vpop.permute.xlu1 %346  ;;  %v438_v19 = vpop.permute.xlu2 %437 }
  0xf7   : > { %v359_v15 = vsel %vm354_vm4, %v345_v36, %v1711_v16  ;;  %v264_v17 = vpop.permute.xlu0 %263 }
  0xf8   : > { %v277_v4 = vsel %vm273_vm8, %v262_v42, %v264_v17  ;;  %v576_v18 = vsel %vm485_vm1, %v359_v15, %v386_v7 }
  0xf9   : > { %v500_v9 = vsel %vm485_vm1, %v1466_v8, %v277_v4  ;;  %725 = vmatpush.bf16.msrb.mxu0 %v576_v18  ;;  %v451_v8 = vsel %vm445_vm3, %v436_v1, %v438_v19 }
  0xfa   : > { %714 = vmatpush.bf16.msra.mxu3 %v500_v9  ;;  %v616_v33 = vsel %vm485_vm1, %v421_v32, %v451_v8 }
  0xfd   : > { %1330 = vmatmul.msk.bf16.vlgmr.msra.gmra.mxu3 %vm637_vm9, %v1742_v31 }
  0xfe   : > { %v470_v20 = vpop.permute.xlu1 %469  ;;  %v1732_v2 = vpop.permute.xlu2 %265 }
  0xff   : > { %v468_v21 = vpop.permute.xlu0 %467  ;;  %v483_v22 = vsel %vm475_vm0, %v470_v20, %v1695_v58  ;;  %v278_v40 = vsel %vm273_vm8, %v264_v17, %v1732_v2 }
 0x100   : > { %v481_v23 = vsel %vm475_vm0, %v466_v43, %v468_v21  ;;  %v482_v24 = vsel %vm475_vm0, %v468_v21, %v470_v20  ;;  %v663_v25 = vsel %vm485_vm1, %v483_v22, 0  ;;  %v504_v38 = vsel %vm485_vm1, %v1477_v12, %v278_v40 }
 0x101   : > { %v657_v26 = vsel %vm485_vm1, %v481_v23, 0  ;;  %v660_v30 = vsel %vm485_vm1, %v482_v24, 0  ;;  %762 = vmatpush.bf16.msrb.mxu3 %v663_v25  ;;  %v1395_v12 = vmov 0  }
 0x102   : > { %736 = vmatpush.bf16.msrb.mxu1 %v657_v26  ;;  %749 = vmatpush.bf16.msrb.mxu2 %v660_v30 }
 0x103   : > { %1375 = vset.pattern.permute.xlu0 %v1395_v12 }
 0x104   : > { %634 = vperm.xlu0 %1375, %v631_v55  }
 0x106   : > { %737 = vmatpush.bf16.msrb.mxu1 %v616_v33  ;;  %v320_v34 = vpop.permute.xlu1 %319  ;;  %v353_v43 = vpop.permute.xlu2 %352 }
 0x107   : > { %v332_v35 = vsel %vm327_vm7, %v318_v52, %v320_v34  ;;  %v293_v36 = vpop.permute.xlu0 %292 }
 0x108   : > { %v305_v37 = vsel %vm300_vm6, %v291_v49, %v293_v36 }
 0x109   : > { %v540_v39 = vsel %vm485_vm1, %v305_v37, %v332_v35 }
 0x10a   : > { %726 = vmatpush.bf16.msrb.mxu0 %v540_v39 }
 0x10e   : > { %727 = vmatpush.bf16.msrb.mxu0 %v504_v38  ;;  %v412_v41 = vpop.permute.xlu1 %411  ;;  %v380_v52 = vpop.permute.xlu2 %379 }
 0x10f   : > { %v410_v42 = vpop.permute.xlu0 %409  ;;  %v592_v33 = vsel %vm485_vm1, %v353_v43, %v380_v52 }
 0x110   : > { %v422_v29 = vsel %vm415_vm2, %v408_v13, %v410_v42  ;;  %v423_v46 = vsel %vm415_vm2, %v410_v42, %v412_v41 }
 0x111   : > { %1331 = vmatmul.msk.bf16.vlgmr.msrb.gmra.mxu0 %vm637_vm9, %v1742_v31 }
 0x116   : > { %v442_v44 = vpop.permute.xlu1 %441  ;;  %v297_v63 = vpop.permute.xlu2 %296 }
 0x117   : > { %v440_v45 = vpop.permute.xlu0 %439 }
 0x118   : > { %v452_v47 = vsel %vm445_vm3, %v438_v19, %v440_v45  ;;  %v453_v48 = vsel %vm445_vm3, %v440_v45, %v442_v44 }
 0x119   : > { %v620_v49 = vsel %vm485_vm1, %v422_v29, %v452_v47  ;;  %v624_v51 = vsel %vm485_vm1, %v423_v46, %v453_v48 }
 0x11a   : > { %750 = vmatpush.bf16.msrb.mxu2 %v620_v49  ;;  %763 = vmatpush.bf16.msrb.mxu3 %v624_v51 }
 0x11e   : > { %v351_v53 = vpop.permute.xlu1 %350  ;;  %v324_v15 = vpop.permute.xlu2 %323 }
 0x11f   : > { %v349_v54 = vpop.permute.xlu0 %348  ;;  %v362_v57 = vsel %vm354_vm4, %v351_v53, %v353_v43 }
 0x120   : > { %v360_v60 = vsel %vm354_vm4, %v1711_v16, %v349_v54  ;;  %v361_v0 = vsel %vm354_vm4, %v349_v54, %v351_v53 }
 0x126   : > { %v378_v56 = vpop.permute.xlu1 %377 }
 0x127   : > { %v389_v61 = vsel %vm381_vm5, %v378_v56, %v380_v52  ;;  %v376_v62 = vpop.permute.xlu0 %375 }
 0x128   : > { %v387_v1 = vsel %vm381_vm5, %v1689_v50, %v376_v62  ;;  %v388_v3 = vsel %vm381_vm5, %v376_v62, %v378_v56  ;;  %v588_v5 = vsel %vm485_vm1, %v362_v57, %v389_v61  ;;  %v1833_v61 = vld [vmem:[%s1937_s3] sm:$0xff] }
 0x129   : > { %v580_v6 = vsel %vm485_vm1, %v360_v60, %v387_v1  ;;  %v584_v10 = vsel %vm485_vm1, %v361_v0, %v388_v3  ;;  %764 = vmatpush.bf16.msrb.mxu3 %v588_v5 }
 0x12a   : > { %738 = vmatpush.bf16.msrb.mxu1 %v580_v6  ;;  %751 = vmatpush.bf16.msrb.mxu2 %v584_v10 }
 0x12e   : > { %v295_v11 = vpop.permute.xlu1 %294 }
 0x12f   : > { %v474_v13 = vpop.permute.xlu0 %473  ;;  %v306_v17 = vsel %vm300_vm6, %v293_v36, %v295_v11  ;;  %v307_v4 = vsel %vm300_vm6, %v295_v11, %v297_v63 }
 0x130   : > { %v484_v16 = vsel %vm475_vm0, %v1695_v58, %v474_v13  ;;  %v444_v58 = vpop.permute.xlu2 %443 }
 0x131   : > { %v666_v7 = vsel %vm485_vm1, %v484_v16, 0  ;;  %v454_v23 = vsel %vm445_vm3, %v442_v44, %v444_v58  ;;  %v1816_v44 = vld [vmem:[%s1938_s4] sm:$0xff] }
 0x132   : > { %775 = vmatpush.bf16.msra.mxu0 %v666_v7  ;;  %v789_v46 = vperm.slane %v1816_v44, 0  ;;  %v792_v48 = vperm.slane %v1816_v44, 3  ;;  %v791_v49 = vperm.slane %v1816_v44, 2  ;;  %v793_v62 = vperm.slane %v1816_v44, 4 }
 0x133   : > { %v794_v11 = vperm.slane %v1816_v44, 5 }
 0x136   : > { %v322_v50 = vpop.permute.xlu1 %321 }
 0x137   : > { %v333_v18 = vsel %vm327_vm7, %v320_v34, %v322_v50  ;;  %v334_v9 = vsel %vm327_vm7, %v322_v50, %v324_v15  ;;  %v299_v19 = vpop.permute.xlu0 %298 }
 0x138   : > { %v544_v20 = vsel %vm485_vm1, %v306_v17, %v333_v18  ;;  %v548_v21 = vsel %vm485_vm1, %v307_v4, %v334_v9  ;;  %v308_v26 = vsel %vm300_vm6, %v297_v63, %v299_v19  ;;  %v272_v34 = vpop.permute.xlu2 %271  ;;  %v796_v17 = vperm.slane %v1816_v44, 7 }
 0x139   : > { %739 = vmatpush.bf16.msrb.mxu1 %v544_v20  ;;  %752 = vmatpush.bf16.msrb.mxu2 %v548_v21  ;;  %v795_v18 = vperm.slane %v1816_v44, 6 }
 0x13e   : > { %v414_v22 = vpop.permute.xlu1 %413 }
 0x13f   : > { %v424_v24 = vsel %vm415_vm2, %v412_v41, %v414_v22  ;;  %v326_v25 = vpop.permute.xlu0 %325 }
 0x140   : > { %v335_v30 = vsel %vm327_vm7, %v324_v15, %v326_v25  ;;  %v628_v8 = vsel %vm485_vm1, %v424_v24, %v454_v23  ;;  %v556_v41 = vsel %vm485_vm1, %v299_v19, %v326_v25  ;;  %v1376_v15 = vld [vmem:[%s1938_s4 + $0x8] ss:$0 sm:$0xff] }
 0x141   : > { %v552_v32 = vsel %vm485_vm1, %v308_v26, %v335_v30  ;;  %776 = vmatpush.bf16.msra.mxu0 %v628_v8 }
 0x142   : > { %765 = vmatpush.bf16.msrb.mxu3 %v552_v32 }
 0x145   : > { %777 = vmatpush.bf16.msra.mxu0 %v592_v33 }
 0x146   : > { %v270_v35 = vpop.permute.xlu1 %269 }
 0x147   : > { %v281_v36 = vsel %vm273_vm8, %v270_v35, %v272_v34  ;;  %v268_v37 = vpop.permute.xlu0 %267 }
 0x148   : > { %v279_v39 = vsel %vm273_vm8, %v1732_v2, %v268_v37  ;;  %v280_v40 = vsel %vm273_vm8, %v268_v37, %v270_v35  ;;  %v516_v38 = vsel %vm485_vm1, %v1552_v27, %v281_v36  ;;  %v520_v27 = vsel %vm485_vm1, %v1608_v59, %v272_v34 }
 0x149   : > { %v508_v42 = vsel %vm485_vm1, %v1515_v14, %v279_v39  ;;  %v512_v43 = vsel %vm485_vm1, %v1554_v28, %v280_v40  ;;  %766 = vmatpush.bf16.msrb.mxu3 %v516_v38  ;;  %778 = vmatpush.bf16.msra.mxu0 %v556_v41  ;;  %v790_v59 = vperm.slane %v1816_v44, 1 }
 0x14a   : > { %740 = vmatpush.bf16.msrb.mxu1 %v508_v42  ;;  %753 = vmatpush.bf16.msrb.mxu2 %v512_v43 }
 0x14c   : > { %1334 = vmatmul.msk.bf16.vlgmr.msrb.gmra.mxu3 %vm637_vm9, %v1742_v31 }
 0x14d   : > { %1332 = vmatmul.msk.bf16.vlgmr.msrb.gmra.mxu1 %vm637_vm9, %v1742_v31  ;;  %1333 = vmatmul.msk.bf16.vlgmr.msrb.gmra.mxu2 %vm637_vm9, %v1742_v31 }
 0x14e   : > { %779 = vmatpush.bf16.msra.mxu0 %v520_v27 }
 0x151   : > { %1335 = vmatmul.msk.bf16.vlgmr.msra.gmra.mxu0 %vm637_vm9, %v1742_v31 }
 0x16d   : > { %v677_v14 = vpop.f32.mrf.mxu0 }
 0x171   : > { %v690_v28 = vpop.f32.mrf.mxu1 }
 0x175   : > { %v679_v29 = vpop.f32.mrf.mxu0 }
 0x176   : > { %v635_v31 = vpop.permute.xlu0 %634 }
 0x177   : > { %v703_v2 = vpop.f32.mrf.mxu2  ;;  %v678_v51 = vadd.f32 %v677_v14, %v635_v31  ;;  %v691_v52 = vadd.f32 %v690_v28, %v635_v31 }
 0x178   : > { %v704_v53 = vadd.f32 %v703_v2, %v635_v31 }
 0x179   : > { %v692_v47 = vpop.f32.mrf.mxu1  ;;  %v1822_v54 = vmul.f32 %v789_v46, %v678_v51  ;;  %v1826_v56 = vmul.f32 %v790_v59, %v691_v52 }
 0x17a   : > { %v1828_v57 = vmul.f32 %v791_v49, %v704_v53 }
 0x17b   : > { %836 = vmatpush.msra.mxu1 %v1822_v54  ;;  %v1001_v63 = vmul.f32 %v1822_v54, %v1822_v54  ;;  %856 = vmatpush.msra.mxu2 %v1826_v56  ;;  %v1002_v30 = vmul.f32 %v1826_v56, %v1826_v56 }
 0x17c   : > { %876 = vmatpush.msra.mxu3 %v1828_v57  ;;  %1337 = vmatmul.msk.f32.vlgmr.msra.gmra.mxu2 %vm817_vm10, %v1833_v61  ;;  %v1003_v32 = vmul.f32 %v1828_v57, %v1828_v57 }
 0x17d   : > { %1025 = vmatpush.msrb.mxu0 %v1001_v63  ;;  %1336 = vmatmul.msk.f32.vlgmr.msra.gmra.mxu1 %vm817_vm10, %v1833_v61 }
 0x17e   : > { %1338 = vmatmul.msk.f32.vlgmr.msra.gmra.mxu3 %vm817_vm10, %v1833_v61  ;;  %1345 = vmatmul.msk.f32.vlgmr.msrb.gmra.mxu0 %vm817_vm10, %v1833_v61 }
 0x17f   : > { %v705_v60 = vpop.f32.mrf.mxu2 }
 0x180   : > { %v716_v45 = vpop.f32.mrf.mxu3 }
 0x181   : > { %v717_v12 = vadd.f32 %v716_v45, %v635_v31 }
 0x183   : > { %v1824_v55 = vmul.f32 %v792_v48, %v717_v12 }
 0x185   : > { %896 = vmatpush.msrb.mxu1 %v1824_v55  ;;  %v1004_v22 = vmul.f32 %v1824_v55, %v1824_v55 }
 0x186   : > { %1339 = vmatmul.msk.f32.vlgmr.msrb.gmra.mxu1 %vm817_vm10, %v1833_v61 }
 0x188   : > { %v718_v0 = vpop.f32.mrf.mxu3 }
 0x18e   : > { %v729_v1 = vpop.f32.mrf.mxu0 }
 0x18f   : > { %v730_v3 = vadd.f32 %v729_v1, %v635_v31 }
 0x191   : > { %v1848_v5 = vmul.f32 %v793_v62, %v730_v3 }
 0x193   : > { %v1005_v6 = vmul.f32 %v1848_v5, %v1848_v5  ;;  %916 = vmatpush.msrb.mxu2 %v1848_v5 }
 0x194   : > { %1340 = vmatmul.msk.f32.vlgmr.msrb.gmra.mxu2 %vm817_vm10, %v1833_v61 }
 0x195   : > { %1105 = vmatpush.msra.mxu0 %v1005_v6 }
 0x196   : > { %v731_v10 = vpop.f32.mrf.mxu0  ;;  %1349 = vmatmul.msk.f32.vlgmr.msra.gmra.mxu0 %vm817_vm10, %v1833_v61 }
 0x1ca   : > { %v742_v13 = vpop.f32.mrf.mxu1 }
 0x1cb   : > { %v743_v16 = vadd.f32 %v742_v13, %v635_v31 }
 0x1cd   : > { %v1862_v7 = vmul.f32 %v794_v11, %v743_v16 }
 0x1ce   : > { %v781_v50 = vpop.f32.mrf.mxu0 }
 0x1cf   : > { %v782_v4 = vadd.f32 %v781_v50, %v635_v31  ;;  %936 = vmatpush.msrb.mxu3 %v1862_v7  ;;  %v768_v9 = vpop.f32.mrf.mxu3  ;;  %v1006_v33 = vmul.f32 %v1862_v7, %v1862_v7 }
 0x1d0   : > { %v755_v19 = vpop.f32.mrf.mxu2  ;;  %v769_v20 = vadd.f32 %v768_v9, %v635_v31  ;;  %1341 = vmatmul.msk.f32.vlgmr.msrb.gmra.mxu3 %vm817_vm10, %v1833_v61 }
 0x1d1   : > { %v1872_v21 = vmul.f32 %v1376_v15, %v782_v4  ;;  %v756_v58 = vadd.f32 %v755_v19, %v635_v31 }
 0x1d2   : > { %v1876_v23 = vmul.f32 %v796_v17, %v769_v20  ;;  %v744_v24 = vpop.f32.mrf.mxu1 }
 0x1d3   : > { %v1009_v25 = vmul.f32 %v1872_v21, %v1872_v21  ;;  %v1880_v26 = vmul.f32 %v795_v18, %v756_v58  ;;  %996 = vmatpush.msra.mxu3 %v1872_v21 }
 0x1d4   : > { %976 = vmatpush.msra.mxu2 %v1876_v23  ;;  %v1008_v34 = vmul.f32 %v1876_v23, %v1876_v23 }
 0x1d5   : > { %1085 = vmatpush.msrb.mxu3 %v1004_v22  ;;  %v1007_v8 = vmul.f32 %v1880_v26, %v1880_v26  ;;  %956 = vmatpush.msra.mxu1 %v1880_v26 }
 0x1d6   : > { %1185 = vmatpush.msrb.mxu0 %v1009_v25  ;;  %v783_v35 = vpop.f32.mrf.mxu0  ;;  %1343 = vmatmul.msk.f32.vlgmr.msra.gmra.mxu2 %vm817_vm10, %v1833_v61 }
 0x1d7   : > { %1045 = vmatpush.msrb.mxu1 %v1002_v30  ;;  %1065 = vmatpush.msrb.mxu2 %v1003_v32  ;;  %v770_v36 = vpop.f32.mrf.mxu3 }
 0x1d8   : > { %1342 = vmatmul.msk.f32.vlgmr.msra.gmra.mxu1 %vm817_vm10, %v1833_v61  ;;  %v757_v37 = vpop.f32.mrf.mxu2  ;;  %1344 = vmatmul.msk.f32.vlgmr.msra.gmra.mxu3 %vm817_vm10, %v1833_v61 }
 0x1d9   : > { %1125 = vmatpush.msra.mxu1 %v1006_v33  ;;  %1145 = vmatpush.msra.mxu2 %v1007_v8 }
 0x1da   : > { %1353 = vmatmul.msk.f32.vlgmr.msrb.gmra.mxu0 %vm817_vm10, %v1833_v61  ;;  %1165 = vmatpush.msra.mxu3 %v1008_v34 }
 0x1de   : > { %1347 = vmatmul.msk.f32.vlgmr.msrb.gmra.mxu2 %vm817_vm10, %v1833_v61 }
 0x1e0   : > { %1346 = vmatmul.msk.f32.vlgmr.msrb.gmra.mxu1 %vm817_vm10, %v1833_v61  ;;  %1348 = vmatmul.msk.f32.vlgmr.msrb.gmra.mxu3 %vm817_vm10, %v1833_v61 }
 0x1e6   : > { %1351 = vmatmul.msk.f32.vlgmr.msra.gmra.mxu2 %vm817_vm10, %v1833_v61 }
 0x1e8   : > { %1350 = vmatmul.msk.f32.vlgmr.msra.gmra.mxu1 %vm817_vm10, %v1833_v61  ;;  %1352 = vmatmul.msk.f32.vlgmr.msra.gmra.mxu3 %vm817_vm10, %v1833_v61 }
 0x1fa   : > { %v838_v39 = vpop.f32.mrf.mxu1 }
 0x1fb   : > { %v1027_v29 = vpop.f32.mrf.mxu0 }
 0x1ff   : > { %v858_v40 = vpop.f32.mrf.mxu2 }
 0x200   : > { %v1190_v38 = vadd.f32 %v858_v40, %v838_v39 }
 0x201   : > { %v878_v41 = vpop.f32.mrf.mxu3 }
 0x202   : > { %v1191_v42 = vadd.f32 %v1190_v38, %v878_v41 }
 0x203   : > { %v898_v43 = vpop.f32.mrf.mxu1 }
 0x204   : > { %v1192_v27 = vadd.f32 %v1191_v42, %v898_v43 }
 0x213   : > { %v1107_v12 = vpop.f32.mrf.mxu0 }
 0x217   : > { %v918_v14 = vpop.f32.mrf.mxu2 }
 0x218   : > { %v1193_v28 = vadd.f32 %v1192_v27, %v918_v14 }
 0x253   : > { %v938_v2 = vpop.f32.mrf.mxu3 }
 0x254   : > { %v1194_v44 = vadd.f32 %v1193_v28, %v938_v2 }
 0x255   : > { %v958_v45 = vpop.f32.mrf.mxu1 }
 0x256   : > { %v1195_v46 = vadd.f32 %v1194_v44, %v958_v45 }
 0x257   : > { %v1187_v6 = vpop.f32.mrf.mxu0 }
 0x258   : > { %v1210_v13 = vsel %vm1197_vm11, %v1187_v6, 0.0 }
 0x259   : > { %v978_v47 = vpop.f32.mrf.mxu2 }
 0x25a   : > { %v1196_v48 = vadd.f32 %v1195_v46, %v978_v47 }
 0x25b   : > { %v998_v59 = vpop.f32.mrf.mxu3 }
 0x25c   : > { %v1198_v49 = vsel %vm1197_vm11, %v998_v59, 0.0 }
 0x25d   : > { %v1047_v31 = vpop.f32.mrf.mxu1  ;;  %v1199_v51 = vadd.f32 %v1198_v49, %v1196_v48 }
 0x25e   : > { %v1203_v52 = vadd.f32 %v1047_v31, %v1027_v29 }
 0x25f   : > { %1200 = vadd.xlane.f32.xlu1 %v1199_v51 }
 0x261   : > { %v1067_v53 = vpop.f32.mrf.mxu2 }
 0x262   : > { %v1204_v60 = vadd.f32 %v1203_v52, %v1067_v53 }
 0x263   : > { %v1087_v61 = vpop.f32.mrf.mxu3 }
 0x264   : > { %v1205_v62 = vadd.f32 %v1204_v60, %v1087_v61 }
 0x265   : > { %v1127_v63 = vpop.f32.mrf.mxu1 }
 0x266   : > { %v1206_v0 = vadd.f32 %v1205_v62, %v1107_v12 }
 0x268   : > { %v1207_v1 = vadd.f32 %v1206_v0, %v1127_v63 }
 0x269   : > { %v1147_v3 = vpop.f32.mrf.mxu2 }
 0x26a   : > { %v1208_v10 = vadd.f32 %v1207_v1, %v1147_v3 }
 0x26b   : > { %v1167_v11 = vpop.f32.mrf.mxu3 }
 0x26c   : > { %v1209_v16 = vadd.f32 %v1208_v10, %v1167_v11 }
 0x26e   : > { %v1211_v15 = vadd.f32 %v1210_v13, %v1209_v16 }
 0x270   : > { %1212 = vadd.xlane.f32.xlu2 %v1211_v15 }
 0x2d2   : > { %v1201_v50 = vpop.xlane.xlu1 %1200 }
 0x2d3   : > { %v1202_v17 = vmul.f32 0.00024414063, %v1201_v50 }
 0x2d5   : > { %v1215_v18 = vmul.f32 %v1202_v17, %v1202_v17  ;;  %v1229_v33 = vsub.f32 %v1822_v54, %v1202_v17  ;;  %v1230_v34 = vsub.f32 %v1826_v56, %v1202_v17  ;;  %v1231_v35 = vsub.f32 %v1828_v57, %v1202_v17 }
 0x2d6   : > { %v1232_v36 = vsub.f32 %v1824_v55, %v1202_v17  ;;  %v1233_v37 = vsub.f32 %v1848_v5, %v1202_v17  ;;  %v1234_v39 = vsub.f32 %v1862_v7, %v1202_v17  ;;  %v1235_v40 = vsub.f32 %v1880_v26, %v1202_v17 }
 0x2d7   : > { %v1236_v54 = vsub.f32 %v1876_v23, %v1202_v17  ;;  %v1237_v55 = vsub.f32 %v1872_v21, %v1202_v17 }
 0x2e3   : > { %v1213_v4 = vpop.xlane.xlu2 %1212 }
 0x2e4   : > { %v1214_v9 = vmul.f32 0.00024414063, %v1213_v4 }
 0x2e6   : > { %v1216_v19 = vsub.f32 %v1214_v9, %v1215_v18 }
 0x2e8   : > { %v1217_v20 = vmax.f32 %v1216_v19, 0.0 }
 0x2ea   : > { %v1218_v58 = vadd.f32 1e-05, %v1217_v20 }
 0x2ec   : > { %1377 = vrsqrt.f32 %v1218_v58  ;;  %vm1225_vm13 = vweird.f32 %v1218_v58 }
 0x2f2   : > { %v1378_v22 = vpop.eup %1377 }
 0x2f3   : > { %v1220_v24 = vmul.f32 %v1378_v22, %v1218_v58  ;;  %vm1226_vm12 = vweird.f32 %v1378_v22 }
 0x2f4   : > { %vm1227_vm14 = vmor %vm1225_vm13, %vm1226_vm12 }
 0x2f5   : > { %v1221_v25 = vmul.f32 %v1378_v22, %v1220_v24 }
 0x2f7   : > { %v1222_v30 = vmul.f32 0.5, %v1221_v25 }
 0x2f9   : > { %v1223_v8 = vsub.f32 1.5, %v1222_v30 }
 0x2fb   : > { %v1224_v32 = vmul.f32 %v1378_v22, %v1223_v8 }
 0x2fd   : > { %v1228_v38 = vsel %vm1227_vm14, %v1378_v22, %v1224_v32 }
 0x2fe   : > { %v1238_v41 = vmul.f32 %v1229_v33, %v1228_v38  ;;  %v1239_v42 = vmul.f32 %v1230_v34, %v1228_v38  ;;  %v1240_v43 = vmul.f32 %v1231_v35, %v1228_v38  ;;  %v1241_v27 = vmul.f32 %v1232_v36, %v1228_v38 }
 0x2ff   : > { %v1242_v56 = vmul.f32 %v1233_v37, %v1228_v38  ;;  %v1243_v57 = vmul.f32 %v1234_v39, %v1228_v38  ;;  %v1244_v5 = vmul.f32 %v1235_v40, %v1228_v38  ;;  %v1245_v26 = vmul.f32 %v1236_v54, %v1228_v38 }
 0x300   : > { %v1247_v14 = vmax.f32 %v1238_v41, 0.0  ;;  %v1248_v7 = vmax.f32 %v1239_v42, 0.0  ;;  %v1249_v28 = vmax.f32 %v1240_v43, 0.0  ;;  %v1250_v2 = vmax.f32 %v1241_v27, 0.0 }
 0x301   : > { %v1246_v44 = vmul.f32 %v1237_v55, %v1228_v38  ;;  %v1251_v45 = vmax.f32 %v1242_v56, 0.0  ;;  %v1252_v29 = vmax.f32 %v1243_v57, 0.0  ;;  %v1253_v46 = vmax.f32 %v1244_v5, 0.0 }
 0x302   : > { %1256 = vst [vmem:[%s224_s21] sm:$0xff] %v1247_v14  ;;  %v1254_v47 = vmax.f32 %v1245_v26, 0.0 }
 0x303   : > { %1257 = vst [vmem:[%s224_s21 + $0x8] sm:$0xff] %v1248_v7  ;;  %v1255_v23 = vmax.f32 %v1246_v44, 0.0 }
 0x304   : > { %1258 = vst [vmem:[%s224_s21 + $0x10] sm:$0xff] %v1249_v28 }
 0x305   : > { %1259 = vst [vmem:[%s224_s21 + $0x18] sm:$0xff] %v1250_v2 }
 0x306   : > { %1260 = vst [vmem:[%s224_s21 + $0x20] sm:$0xff] %v1251_v45 }
 0x307   : > { %1261 = vst [vmem:[%s224_s21 + $0x28] sm:$0xff] %v1252_v29 }
 0x308   : > { %1262 = vst [vmem:[%s224_s21 + $0x30] sm:$0xff] %v1253_v46 }
 0x309   : > { %1263 = vst [vmem:[%s224_s21 + $0x38] sm:$0xff] %v1254_v47 }
 0x30a   : > { %1264 = vst.msk [vmem:[%s224_s21 + $0x40] sm:$0xff] %vm1197_vm11, %v1255_v23 }
 0x30b PF: > { %s15_s18 = sadd.s32 1, %s1385_s18  }
 0x30c   : > { %p12_p4 = scmp.ge.s32.totalorder %s15_s18, 4  }
 0x30e   :  { %14 = sbr.rel (!%p12_p4) target bundleno = 1 (0x1), region = 70 }

</bundles_post_ra>
